<compile_context>
chip_gen: v7x
topology: tpu7x:2x2x1
jax: 0.10.0
libtpu: 0.0.40
codegen_flags: <defaults>
</compile_context>

<pallas_src>
import functools

import jax
import jax.numpy as jnp
from jax.experimental import pallas as pl
from jax.experimental.pallas import tpu as pltpu


def _round_up(n, m):
    return (n + m - 1) // m * m


# ---------------------------------------------------------------------------
# Kernel: whole-network forward for one batch tile, entirely in VMEM.
# ---------------------------------------------------------------------------
def ae_kernel(x_ref,
              w1_ref, b1_ref, w2_ref, b2_ref,
              w3_ref, b3_ref, w4_ref, b4_ref,
              xr_ref, z_ref):
    x = x_ref[...]                                                   # bf16 (tb, img_p)

    # ---- encode ----
    h1 = jnp.dot(x, w1_ref[...], preferred_element_type=jnp.float32) + b1_ref[...]
    h1 = jnp.maximum(h1, 0.0)                                        # ReLU (f32)
    # fc2 (latent) stays f32 end-to-end for closer parity with torch f32.
    z = jnp.dot(h1, w2_ref[...], preferred_element_type=jnp.float32) + b2_ref[...]

    # ---- decode ----
    h3 = jnp.dot(z.astype(jnp.bfloat16), w3_ref[...],
                 preferred_element_type=jnp.float32) + b3_ref[...]
    h3 = jnp.maximum(h3, 0.0)                                        # ReLU (f32)
    logits = jnp.dot(h3.astype(jnp.bfloat16), w4_ref[...],
                     preferred_element_type=jnp.float32) + b4_ref[...]

    xr_ref[...] = jax.nn.sigmoid(logits).astype(xr_ref.dtype)
    z_ref[...] = z


# ---------------------------------------------------------------------------
# One-time parameter preparation (hoisted out of the per-step path).
# ---------------------------------------------------------------------------
def prepare_params(params):
    """Pad feature dims to multiples of 128 and cast the big weights to bf16."""
    (w1, b1), (w2, b2), (w3, b3), (w4, b4) = params
    img_size, h_dim = w1.shape
    z_dim = w2.shape[1]
    img_p = _round_up(img_size, 128)     # 784 -> 896
    h_p = _round_up(h_dim, 128)          # 400 -> 512
    z_p = _round_up(z_dim, 128)          #  20 -> 128

    def pad2(a, r, c):
        return jnp.pad(a, ((0, r - a.shape[0]), (0, c - a.shape[1])))

    def padb(b, c):
        return jnp.pad(b, (0, c - b.shape[0])).reshape(1, c).astype(jnp.float32)

    padded = dict(
        w1=pad2(w1, img_p, h_p).astype(jnp.bfloat16), b1=padb(b1, h_p),
        w2=pad2(w2, h_p, z_p).astype(jnp.float32),    b2=padb(b2, z_p),   # f32 latent
        w3=pad2(w3, z_p, h_p).astype(jnp.bfloat16),   b3=padb(b3, h_p),
        w4=pad2(w4, h_p, img_p).astype(jnp.bfloat16), b4=padb(b4, img_p),
    )
    dims = dict(img_size=img_size, h_dim=h_dim, z_dim=z_dim)
    return padded, dims


# ---------------------------------------------------------------------------
# Tiling policy.
# ---------------------------------------------------------------------------
def _max_batch_tile_for_device():
    try:
        kind = jax.devices()[0].device_kind.lower()
    except Exception:  # pragma: no cover - defensive
        return 512
    if "v6" in kind or "v7" in kind or "7x" in kind:
        return 1024           # v6e / v7x: big tiles, 32 MiB scoped VMEM default
    return 512                # v5e & older: fits 16 MiB scoped default comfortably


def _select_batch_tile(B):
    B16 = _round_up(B, 16)    # bf16 packs 16 sublanes / vreg
    if B16 <= 16:
        return 16
    # >=2 grid steps so ("parallel",) can shard across v7x's two TensorCores,
    # while keeping tiles large enough to amortize per-grid-step overhead.
    half = _round_up((B16 + 1) // 2, 16)
    return min(_max_batch_tile_for_device(), half)


# ---------------------------------------------------------------------------
# Forward (jitted: pad/cast of x, kernel, and output slices all fuse).
# ---------------------------------------------------------------------------
def _ae_forward_padded(x, pp, *, img_size, h_dim, z_dim,
                       batch_tile=None, single_buffer_weights=False,
                       out_dtype=jnp.float32):
    B = x.shape[0]
    img_p = _round_up(img_size, 128)
    h_p = _round_up(h_dim, 128)
    z_p = _round_up(z_dim, 128)

    if batch_tile is None:
        batch_tile = _select_batch_tile(B)
    B_p = _round_up(max(B, batch_tile), batch_tile)
    grid = (B_p // batch_tile,)

    xp = jnp.pad(x, ((0, B_p - B), (0, img_p - img_size))).astype(jnp.bfloat16)

    def wspec(shape):
        # Constant index_map -> weights DMA'd once, stay VMEM resident.
        if single_buffer_weights:
            return pl.BlockSpec(shape, lambda i: (0, 0), pipeline_mode=pl.Buffered(1))
        return pl.BlockSpec(shape, lambda i: (0, 0))

    def rows(shape):
        return pl.BlockSpec(shape, lambda i: (i, 0))

    x_rec_p, z_pad = pl.pallas_call(
        ae_kernel,
        out_shape=(
            jax.ShapeDtypeStruct((B_p, img_p), out_dtype),
            jax.ShapeDtypeStruct((B_p, z_p), jnp.float32),
        ),
        grid_spec=pltpu.PrefetchScalarGridSpec(
            num_scalar_prefetch=0,
            grid=grid,
            in_specs=[
                rows((batch_tile, img_p)),                       # x tile
                wspec((img_p, h_p)), wspec((1, h_p)),            # fc1
                wspec((h_p, z_p)),   wspec((1, z_p)),            # fc2
                wspec((z_p, h_p)),   wspec((1, h_p)),            # fc3
                wspec((h_p, img_p)), wspec((1, img_p)),          # fc4
            ],
            out_specs=[
                rows((batch_tile, img_p)),                       # x_reconst tile
                rows((batch_tile, z_p)),                         # z tile
            ],
        ),
        compiler_params=pltpu.CompilerParams(
            dimension_semantics=("parallel",),
            vmem_limit_bytes=48 << 20,
        ),
    )(xp, pp["w1"], pp["b1"], pp["w2"], pp["b2"],
      pp["w3"], pp["b3"], pp["w4"], pp["b4"])

    x_rec = x_rec_p[:B, :img_size]
    z = z_pad[:B, :z_dim]
    return x_rec, {"z": z}


def make_ae_forward(params, *, batch_tile=None, single_buffer_weights=False,
                    out_dtype=jnp.float32):
    """Prepare (pad/cast) the weights once and return a jitted forward fn."""
    padded, dims = prepare_params(params)
    fwd = jax.jit(functools.partial(
        _ae_forward_padded,
        batch_tile=batch_tile,
        single_buffer_weights=single_buffer_weights,
        out_dtype=out_dtype,
        **dims))
    return lambda x: fwd(x, padded)


def ae_forward(x, params):
    """One-shot convenience wrapper (prefer make_ae_forward for repeated calls)."""
    return make_ae_forward(params)(x)


# ---------------------------------------------------------------------------
# Reference / init helpers.
# ---------------------------------------------------------------------------
def init_linear(key, in_dim, out_dim):
    """PyTorch nn.Linear-style init (uniform ±1/sqrt(in)); W stored (in, out)."""
    kw, kb = jax.random.split(key)
    bound = 1.0 / jnp.sqrt(float(in_dim))
    w = jax.random.uniform(kw, (in_dim, out_dim), jnp.float32, -bound, bound)
    b = jax.random.uniform(kb, (out_dim,), jnp.float32, -bound, bound)
    return w, b


def ae_reference(x, params):
    """Pure-JAX f32 reference of the torch forward."""
    (w1, b1), (w2, b2), (w3, b3), (w4, b4) = params
    h = jax.nn.relu(x @ w1 + b1)
    z = h @ w2 + b2
    h = jax.nn.relu(z @ w3 + b3)
    x_rec = jax.nn.sigmoid(h @ w4 + b4)
    return x_rec, z


if __name__ == "__main__":
    # Module-consistent shapes (AE defaults): img 784, hidden 400, latent 20.
    img_size, h_dim, z_dim = 784, 400, 20
    batch = 16

    key = jax.random.PRNGKey(0)
    k_x, k1, k2, k3, k4 = jax.random.split(key, 5)

    params = (
        init_linear(k1, img_size, h_dim),   # fc1
        init_linear(k2, h_dim, z_dim),      # fc2
        init_linear(k3, z_dim, h_dim),      # fc3
        init_linear(k4, h_dim, img_size),   # fc4
    )

    x = jax.random.uniform(k_x, (batch, img_size), jnp.float32)  # MNIST-like in [0,1)

    forward = make_ae_forward(params)       # weights padded / cast exactly once
    x_rec, kwouts = forward(x)
    x_rec = jax.block_until_ready(x_rec)
    z = jax.block_until_ready(kwouts["z"])

    # Verify against the pure-JAX f32 reference (bf16 fc1/fc3/fc4 => loosened tol).
    x_rec_ref, z_ref = ae_reference(x, params)
    assert x_rec.shape == (batch, img_size) and z.shape == (batch, z_dim)
    assert jnp.allclose(x_rec, x_rec_ref, atol=1e-2, rtol=1e-2), "x_reconst mismatch"
    assert jnp.allclose(z, z_ref, atol=2e-2, rtol=2e-2), "z mismatch"

    print("KERNEL_OK")
</pallas_src>

<mosaic_0001>
module attributes {stable_mosaic.version = 11 : i64} {
  func.func @ae_kernel(%arg0: i32, %arg1: memref<16x896xbf16, #tpu.memory_space<vmem>>, %arg2: memref<896x512xbf16, #tpu.memory_space<vmem>>, %arg3: memref<1x512xf32, #tpu.memory_space<vmem>>, %arg4: memref<512x128xf32, #tpu.memory_space<vmem>>, %arg5: memref<1x128xf32, #tpu.memory_space<vmem>>, %arg6: memref<128x512xbf16, #tpu.memory_space<vmem>>, %arg7: memref<1x512xf32, #tpu.memory_space<vmem>>, %arg8: memref<512x896xbf16, #tpu.memory_space<vmem>>, %arg9: memref<1x896xf32, #tpu.memory_space<vmem>>, %arg10: memref<16x896xf32, #tpu.memory_space<vmem>>, %arg11: memref<16x128xf32, #tpu.memory_space<vmem>>) attributes {dimension_semantics = [#tpu.dimension_semantics<parallel>], iteration_bounds = array<i64: 1>, scalar_prefetch = 0 : i64, scratch_operands = 0 : i64, tpu.core_type = #tpu.core_type<tc>, window_params = [{transform_indices = @transform_0, window_bounds = array<i64: 16, 896>}, {pipeline_mode = #tpu.pipeline_mode<synchronous>, transform_indices = @transform_1, window_bounds = array<i64: 896, 512>}, {pipeline_mode = #tpu.pipeline_mode<synchronous>, transform_indices = @transform_2, window_bounds = array<i64: 1, 512>}, {pipeline_mode = #tpu.pipeline_mode<synchronous>, transform_indices = @transform_3, window_bounds = array<i64: 512, 128>}, {pipeline_mode = #tpu.pipeline_mode<synchronous>, transform_indices = @transform_4, window_bounds = array<i64: 1, 128>}, {pipeline_mode = #tpu.pipeline_mode<synchronous>, transform_indices = @transform_5, window_bounds = array<i64: 128, 512>}, {pipeline_mode = #tpu.pipeline_mode<synchronous>, transform_indices = @transform_6, window_bounds = array<i64: 1, 512>}, {pipeline_mode = #tpu.pipeline_mode<synchronous>, transform_indices = @transform_7, window_bounds = array<i64: 512, 896>}, {pipeline_mode = #tpu.pipeline_mode<synchronous>, transform_indices = @transform_8, window_bounds = array<i64: 1, 896>}, {transform_indices = @transform_9, window_bounds = array<i64: 16, 896>}, {transform_indices = @transform_10, window_bounds = array<i64: 16, 128>}]} {
    %c0 = arith.constant 0 : index
    %c0_0 = arith.constant 0 : index
    %0 = vector.load %arg1[%c0, %c0_0] : memref<16x896xbf16, #tpu.memory_space<vmem>>, vector<16x896xbf16>
    %c0_1 = arith.constant 0 : index
    %c0_2 = arith.constant 0 : index
    %1 = vector.load %arg2[%c0_1, %c0_2] : memref<896x512xbf16, #tpu.memory_space<vmem>>, vector<896x512xbf16>
    %cst = arith.constant dense<0.000000e+00> : vector<16x512xf32>
    %2 = tpu.matmul %0, %1, %cst {dimension_numbers = #tpu.dot_dimension_numbers<[1], [0], [0], [1], [0, 0, 1, 1], [], []>} : vector<16x896xbf16>, vector<896x512xbf16>, vector<16x512xf32> -> vector<16x512xf32>
    %c0_3 = arith.constant 0 : index
    %c0_4 = arith.constant 0 : index
    %3 = vector.load %arg3[%c0_3, %c0_4] : memref<1x512xf32, #tpu.memory_space<vmem>>, vector<1x512xf32>
    %4 = vector.broadcast %3 : vector<1x512xf32> to vector<16x512xf32>
    %5 = arith.addf %2, %4 : vector<16x512xf32>
    %cst_5 = arith.constant 0.000000e+00 : f32
    %6 = vector.broadcast %cst_5 : f32 to vector<16x512xf32>
    %7 = arith.maximumf %5, %6 : vector<16x512xf32>
    %c0_6 = arith.constant 0 : index
    %c0_7 = arith.constant 0 : index
    %8 = vector.load %arg4[%c0_6, %c0_7] : memref<512x128xf32, #tpu.memory_space<vmem>>, vector<512x128xf32>
    %cst_8 = arith.constant dense<0.000000e+00> : vector<16x128xf32>
    %9 = tpu.matmul %7, %8, %cst_8 {dimension_numbers = #tpu.dot_dimension_numbers<[1], [0], [0], [1], [0, 0, 1, 1], [], []>} : vector<16x512xf32>, vector<512x128xf32>, vector<16x128xf32> -> vector<16x128xf32>
    %c0_9 = arith.constant 0 : index
    %c0_10 = arith.constant 0 : index
    %10 = vector.load %arg5[%c0_9, %c0_10] : memref<1x128xf32, #tpu.memory_space<vmem>>, vector<1x128xf32>
    %11 = vector.broadcast %10 : vector<1x128xf32> to vector<16x128xf32>
    %12 = arith.addf %9, %11 : vector<16x128xf32>
    %13 = arith.truncf %12 : vector<16x128xf32> to vector<16x128xbf16>
    %c0_11 = arith.constant 0 : index
    %c0_12 = arith.constant 0 : index
    %14 = vector.load %arg6[%c0_11, %c0_12] : memref<128x512xbf16, #tpu.memory_space<vmem>>, vector<128x512xbf16>
    %cst_13 = arith.constant dense<0.000000e+00> : vector<16x512xf32>
    %15 = tpu.matmul %13, %14, %cst_13 {dimension_numbers = #tpu.dot_dimension_numbers<[1], [0], [0], [1], [0, 0, 1, 1], [], []>} : vector<16x128xbf16>, vector<128x512xbf16>, vector<16x512xf32> -> vector<16x512xf32>
    %c0_14 = arith.constant 0 : index
    %c0_15 = arith.constant 0 : index
    %16 = vector.load %arg7[%c0_14, %c0_15] : memref<1x512xf32, #tpu.memory_space<vmem>>, vector<1x512xf32>
    %17 = vector.broadcast %16 : vector<1x512xf32> to vector<16x512xf32>
    %18 = arith.addf %15, %17 : vector<16x512xf32>
    %cst_16 = arith.constant 0.000000e+00 : f32
    %19 = vector.broadcast %cst_16 : f32 to vector<16x512xf32>
    %20 = arith.maximumf %18, %19 : vector<16x512xf32>
    %21 = arith.truncf %20 : vector<16x512xf32> to vector<16x512xbf16>
    %c0_17 = arith.constant 0 : index
    %c0_18 = arith.constant 0 : index
    %22 = vector.load %arg8[%c0_17, %c0_18] : memref<512x896xbf16, #tpu.memory_space<vmem>>, vector<512x896xbf16>
    %cst_19 = arith.constant dense<0.000000e+00> : vector<16x896xf32>
    %23 = tpu.matmul %21, %22, %cst_19 {dimension_numbers = #tpu.dot_dimension_numbers<[1], [0], [0], [1], [0, 0, 1, 1], [], []>} : vector<16x512xbf16>, vector<512x896xbf16>, vector<16x896xf32> -> vector<16x896xf32>
    %c0_20 = arith.constant 0 : index
    %c0_21 = arith.constant 0 : index
    %24 = vector.load %arg9[%c0_20, %c0_21] : memref<1x896xf32, #tpu.memory_space<vmem>>, vector<1x896xf32>
    %25 = vector.broadcast %24 : vector<1x896xf32> to vector<16x896xf32>
    %26 = arith.addf %23, %25 : vector<16x896xf32>
    %27 = arith.negf %26 : vector<16x896xf32>
    %28 = math.exp %27 : vector<16x896xf32>
    %cst_22 = arith.constant 1.000000e+00 : f32
    %29 = vector.broadcast %cst_22 : f32 to vector<16x896xf32>
    %30 = arith.addf %29, %28 : vector<16x896xf32>
    %31 = arith.divf %29, %30 : vector<16x896xf32>
    %c0_23 = arith.constant 0 : index
    %c0_24 = arith.constant 0 : index
    %32 = vector.load %arg10[%c0_23, %c0_24] : memref<16x896xf32, #tpu.memory_space<vmem>>, vector<16x896xf32>
    tpu.vector_store %arg10[%c0_23, %c0_24], %31 {strides = array<i32>} : memref<16x896xf32, #tpu.memory_space<vmem>>, vector<16x896xf32>,
    %c0_25 = arith.constant 0 : index
    %c0_26 = arith.constant 0 : index
    %33 = vector.load %arg11[%c0_25, %c0_26] : memref<16x128xf32, #tpu.memory_space<vmem>>, vector<16x128xf32>
    tpu.vector_store %arg11[%c0_25, %c0_26], %12 {strides = array<i32>} : memref<16x128xf32, #tpu.memory_space<vmem>>, vector<16x128xf32>,
    return
  }
  func.func @transform_0(%arg0: i32) -> (i32, i32) {
    %c0_i32 = arith.constant 0 : i32
    %c0_i32_0 = arith.constant 0 : i32
    return %arg0, %c0_i32 : i32, i32
  }
  func.func @transform_1(%arg0: i32) -> (i32, i32) {
    %c0_i32 = arith.constant 0 : i32
    %c0_i32_0 = arith.constant 0 : i32
    %c0_i32_1 = arith.constant 0 : i32
    return %c0_i32, %c0_i32_0 : i32, i32
  }
  func.func @transform_2(%arg0: i32) -> (i32, i32) {
    %c0_i32 = arith.constant 0 : i32
    %c0_i32_0 = arith.constant 0 : i32
    %c0_i32_1 = arith.constant 0 : i32
    return %c0_i32, %c0_i32_0 : i32, i32
  }
  func.func @transform_3(%arg0: i32) -> (i32, i32) {
    %c0_i32 = arith.constant 0 : i32
    %c0_i32_0 = arith.constant 0 : i32
    %c0_i32_1 = arith.constant 0 : i32
    return %c0_i32, %c0_i32_0 : i32, i32
  }
  func.func @transform_4(%arg0: i32) -> (i32, i32) {
    %c0_i32 = arith.constant 0 : i32
    %c0_i32_0 = arith.constant 0 : i32
    %c0_i32_1 = arith.constant 0 : i32
    return %c0_i32, %c0_i32_0 : i32, i32
  }
  func.func @transform_5(%arg0: i32) -> (i32, i32) {
    %c0_i32 = arith.constant 0 : i32
    %c0_i32_0 = arith.constant 0 : i32
    %c0_i32_1 = arith.constant 0 : i32
    return %c0_i32, %c0_i32_0 : i32, i32
  }
  func.func @transform_6(%arg0: i32) -> (i32, i32) {
    %c0_i32 = arith.constant 0 : i32
    %c0_i32_0 = arith.constant 0 : i32
    %c0_i32_1 = arith.constant 0 : i32
    return %c0_i32, %c0_i32_0 : i32, i32
  }
  func.func @transform_7(%arg0: i32) -> (i32, i32) {
    %c0_i32 = arith.constant 0 : i32
    %c0_i32_0 = arith.constant 0 : i32
    %c0_i32_1 = arith.constant 0 : i32
    return %c0_i32, %c0_i32_0 : i32, i32
  }
  func.func @transform_8(%arg0: i32) -> (i32, i32) {
    %c0_i32 = arith.constant 0 : i32
    %c0_i32_0 = arith.constant 0 : i32
    %c0_i32_1 = arith.constant 0 : i32
    return %c0_i32, %c0_i32_0 : i32, i32
  }
  func.func @transform_9(%arg0: i32) -> (i32, i32) {
    %c0_i32 = arith.constant 0 : i32
    %c0_i32_0 = arith.constant 0 : i32
    return %arg0, %c0_i32 : i32, i32
  }
  func.func @transform_10(%arg0: i32) -> (i32, i32) {
    %c0_i32 = arith.constant 0 : i32
    %c0_i32_0 = arith.constant 0 : i32
    return %arg0, %c0_i32 : i32, i32
  }
}

</mosaic_0001>

<bundles_post_ra>
// kernel: _ae_forward_padded.1
= control target key start
LH: loop header
LB: loop body
LE: loop exit
PB: predicated region body
PF: predicated region fallthrough
CT: control target
= control target key end

     0   :  { %16 = vsyncpa [#allocation3], 0  ;;  %s6299_s0 = inlined_call_operand.vmem [shape: bf16[16,896], index: 0, kind: input, shape index: {}]   ;;  %s6300_s1 = inlined_call_operand.hbm [shape: bf16[896,512], index: 1, kind: input, shape index: {}]   ;;  %s6301_s2 = inlined_call_operand.vmem [shape: f32[1,512], index: 2, kind: input, shape index: {}]   ;;  %s6302_s3 = inlined_call_operand.hbm [shape: f32[512,128], index: 3, kind: input, shape index: {}]   ;;  %s6303_s4 = inlined_call_operand.vmem [shape: f32[1,128], index: 4, kind: input, shape index: {}]   ;;  %s6304_s5 = inlined_call_operand.vmem [shape: bf16[128,512], index: 5, kind: input, shape index: {}]   ;;  %s6305_s6 = inlined_call_operand.vmem [shape: f32[1,512], index: 6, kind: input, shape index: {}]   ;;  %s6306_s7 = inlined_call_operand.hbm [shape: bf16[512,896], index: 7, kind: input, shape index: {}]   ;;  %s6307_s8 = inlined_call_operand.vmem [shape: f32[1,896], index: 8, kind: input, shape index: {}]   ;;  %s6308_s9 = inlined_call_operand.hbm [shape: f32[16,896], index: 9, kind: output, shape index: {0}]   ;;  %s6309_s10 = inlined_call_operand.hbm [shape: f32[16,128], index: 10, kind: output, shape index: {1}]  }
   0x1   :  { %17 = vsyncpa [#allocation6], 0 }
   0x2   :  { %18 = vsyncpa [#allocation4], 0 }
   0x3   :  { %19 = vsyncpa [#allocation10], 0  ;;  %s5938_s13 = smov [#allocation5]   ;;  %s5820_s17 = scalar_lea.hbm %s6302_s3, 8192 }
   0x4   :  { %s41_s14 = sshll.u32 %s5938_s13, 4  ;;  %p5821_p0 = scmp.ne.s32.totalorder %s6302_s3, %s5820_s17  ;;  %s42_s14 = int_to_ptr.vmem [resolvable:$true] %s41_s14 }
   0x5   :  { %p5824_p1 = scmp.lt.u32.totalorder %s5820_s17, %s6302_s3 }
   0x7   :  { %p5826_p2 = pnand %p5824_p1, %p5821_p0 }
   0x9   :  { %5829 = shalt.err (!%p5826_p2)
}
   0xa   :  { %s5830_s22 = scalar_lea.vmem %s42_s14, 8192  ;;  %p5835_p4 = scmp.lt.s32.totalorder %s42_s14, %s42_s14 }
   0xb   :  { %p5831_p3 = scmp.ne.s32.totalorder %s42_s14, %s5830_s22  ;;  %p5836_p5 = scmp.lt.s32.totalorder %s5830_s22, %s5830_s22 }
   0xd   :  { %p5837_p6 = por %p5836_p5, %p5835_p4 }
   0xf   :  { %p5838_p7 = pnand %p5837_p6, %p5831_p3 }
  0x11   :  { %5841 = shalt.err (!%p5838_p7)
}
  0x12   :  { %s5939_s23 = smov 128   ;;  %s5940_s24 = smov 8  }
  0x13   :  { %47 = dma.hbm_to_vmem [thread:$0]  %s6302_s3, 8192, %s42_s14, [#allocation6], %s5939_s23, %s5939_s23, %s5940_s24  }
  0x14   :  { %s5941_s27 = smov [#allocation2]   ;;  %s5842_s11 = scalar_lea.hbm %s6300_s1, 28672 }
  0x15   :  { %s27_s28 = sshll.u32 %s5941_s27, 4  ;;  %p5843_p8 = scmp.ne.s32.totalorder %s6300_s1, %s5842_s11  ;;  %s28_s28 = int_to_ptr.vmem [resolvable:$true] %s27_s28 }
  0x16   :  { %p5846_p9 = scmp.lt.u32.totalorder %s5842_s11, %s6300_s1 }
  0x18   :  { %p5848_p10 = pnand %p5846_p9, %p5843_p8 }
  0x1a   :  { %5851 = shalt.err (!%p5848_p10)
}
  0x1b   :  { %s5852_s17 = scalar_lea.vmem %s28_s28, 28672  ;;  %p5857_p12 = scmp.lt.s32.totalorder %s28_s28, %s28_s28 }
  0x1c   :  { %p5853_p11 = scmp.ne.s32.totalorder %s28_s28, %s5852_s17  ;;  %p5858_p13 = scmp.lt.s32.totalorder %s5852_s17, %s5852_s17 }
  0x1e   :  { %p5859_p0 = por %p5858_p13, %p5857_p12 }
  0x20   :  { %p5860_p1 = pnand %p5859_p0, %p5853_p11 }
  0x22   :  { %5863 = shalt.err (!%p5860_p1)
}
  0x23   :  { %s5942_s3 = smov 256   ;;  %s5943_s14 = smov 16  }
  0x24   :  { %33 = dma.hbm_to_vmem [thread:$0]  %s6300_s1, 28672, %s28_s28, [#allocation3], %s5942_s3, %s5942_s3, %s5943_s14  }
  0x25   :  { %s5944_s20 = smov [#allocation7]   ;;  %s5864_s26 = scalar_lea.hbm %s6306_s7, 28672 }
  0x26   :  { %s59_s21 = sshll.u32 %s5944_s20, 4  ;;  %p5865_p2 = scmp.ne.s32.totalorder %s6306_s7, %s5864_s26  ;;  %s60_s21 = int_to_ptr.vmem [resolvable:$true] %s59_s21 }
  0x27   :  { %p5868_p3 = scmp.lt.u32.totalorder %s5864_s26, %s6306_s7 }
  0x29   :  { %p5870_p4 = pnand %p5868_p3, %p5865_p2 }
  0x2b   :  { %5873 = shalt.err (!%p5870_p4)
}
  0x2c   :  { %s5874_s12 = scalar_lea.vmem %s60_s21, 28672  ;;  %p5879_p6 = scmp.lt.s32.totalorder %s60_s21, %s60_s21 }
  0x2d   :  { %p5875_p5 = scmp.ne.s32.totalorder %s60_s21, %s5874_s12  ;;  %p5880_p7 = scmp.lt.s32.totalorder %s5874_s12, %s5874_s12 }
  0x2f   :  { %p5881_p8 = por %p5880_p7, %p5879_p6 }
  0x31   :  { %p5882_p9 = pnand %p5881_p8, %p5875_p5 }
  0x33   :  { %5885 = shalt.err (!%p5882_p9)
}
  0x34   :  { %s5945_s1 = smov 448   ;;  %s5946_s28 = smov 28  }
  0x35   :  { %65 = dma.hbm_to_vmem [thread:$0]  %s6306_s7, 28672, %s60_s21, [#allocation6], %s5945_s1, %s5945_s1, %s5946_s28  }
  0x36   :  { %5930 = dma.done.wait [#allocation3], 28672  }
  0x37   :  { %5931 = vsyncadd [#allocation3], 4294938624 }
  0x38   :  { %5932 = dma.done.wait [#allocation6], 36864  }
  0x39   :  { %5933 = vsyncadd [#allocation6], 4294930432  ;;  %v5947_v0 = vmov 0   ;;  %v5049_v1 = vld [vmem:[#allocation2 + $0x4] ss:$16 sps:$4 sm:$0xff]  }
  0x3a   :  { %1649 = vmatprep.mubr.bf16.mxu1 %v5947_v0  ;;  %v5051_v2 = vld [vmem:[#allocation2 + $0x604] ss:$16 sps:$4 sm:$0xff]   ;;  %1488 = vmatprep.subr.bf16.mxu0 %v5049_v1  ;;  %v5053_v3 = vld [vmem:[#allocation2] ss:$16 sps:$4 sm:$0xff]   ;;  %v5102_v34 = vld [vmem:[#allocation2 + $0xc] ss:$16 sps:$4 sm:$0xff]  }
  0x3b   :  { %v5054_v4 = vld [vmem:[#allocation2 + $0x600] ss:$16 sps:$4 sm:$0xff]   ;;  %1617 = vmatprep.subr.bf16.mxu1 %v5051_v2  ;;  %v5055_v5 = vld [vmem:[#allocation2 + $0x24] ss:$16 sps:$4 sm:$0xff]   ;;  %1489 = vmatpush1.bf16.msra.mxu0 %v5053_v3  ;;  %v5100_v36 = vld [vmem:[#allocation2 + $0x8] ss:$16 sps:$4 sm:$0xff]  }
  0x3c   :  { %1618 = vmatpush1.bf16.msra.mxu1 %v5054_v4  ;;  %v5057_v6 = vld [vmem:[#allocation2 + $0x624] ss:$16 sps:$4 sm:$0xff]   ;;  %v5059_v7 = vld [vmem:[#allocation2 + $0x20] ss:$16 sps:$4 sm:$0xff]   ;;  %1490 = vmatprep.subr.bf16.mxu0 %v5055_v5  ;;  %v5108_v39 = vld [vmem:[#allocation2 + $0x2c] ss:$16 sps:$4 sm:$0xff]  }
  0x3d   :  { %v5060_v8 = vld [vmem:[#allocation2 + $0x620] ss:$16 sps:$4 sm:$0xff]   ;;  %1619 = vmatprep.subr.bf16.mxu1 %v5057_v6  ;;  %v5061_v9 = vld [vmem:[#allocation2 + $0x44] ss:$16 sps:$4 sm:$0xff]   ;;  %v5106_v40 = vld [vmem:[#allocation2 + $0x28] ss:$16 sps:$4 sm:$0xff]  }
  0x3e   :  { %v5063_v10 = vld [vmem:[#allocation2 + $0x644] ss:$16 sps:$4 sm:$0xff]   ;;  %v5065_v11 = vld [vmem:[#allocation2 + $0x40] ss:$16 sps:$4 sm:$0xff]   ;;  %v5114_v43 = vld [vmem:[#allocation2 + $0x4c] ss:$16 sps:$4 sm:$0xff]  }
  0x3f   :  { %v5066_v12 = vld [vmem:[#allocation2 + $0x640] ss:$16 sps:$4 sm:$0xff]   ;;  %1491 = vmatpush1.bf16.msra.mxu0 %v5059_v7  ;;  %v5067_v13 = vld [vmem:[#allocation2 + $0x64] ss:$16 sps:$4 sm:$0xff]   ;;  %v5112_v44 = vld [vmem:[#allocation2 + $0x48] ss:$16 sps:$4 sm:$0xff]  }
  0x40   :  { %1620 = vmatpush1.bf16.msra.mxu1 %v5060_v8  ;;  %1492 = vmatprep.subr.bf16.mxu0 %v5061_v9  ;;  %v5069_v14 = vld [vmem:[#allocation2 + $0x664] ss:$16 sps:$4 sm:$0xff]   ;;  %v5071_v15 = vld [vmem:[#allocation2 + $0x60] ss:$16 sps:$4 sm:$0xff]   ;;  %v5120_v47 = vld [vmem:[#allocation2 + $0x6c] ss:$16 sps:$4 sm:$0xff]  }
  0x41   :  { %1621 = vmatprep.subr.bf16.mxu1 %v5063_v10  ;;  %v5072_v16 = vld [vmem:[#allocation2 + $0x660] ss:$16 sps:$4 sm:$0xff]   ;;  %v5073_v17 = vld [vmem:[#allocation2 + $0x84] ss:$16 sps:$4 sm:$0xff]   ;;  %v5118_v48 = vld [vmem:[#allocation2 + $0x68] ss:$16 sps:$4 sm:$0xff]  }
  0x42   :  { %v5075_v18 = vld [vmem:[#allocation2 + $0x684] ss:$16 sps:$4 sm:$0xff]   ;;  %v5077_v19 = vld [vmem:[#allocation2 + $0x80] ss:$16 sps:$4 sm:$0xff]   ;;  %v5126_v52 = vld [vmem:[#allocation2 + $0x8c] ss:$16 sps:$4 sm:$0xff]  }
  0x43   :  { %1493 = vmatpush1.bf16.msra.mxu0 %v5065_v11  ;;  %v5078_v20 = vld [vmem:[#allocation2 + $0x680] ss:$16 sps:$4 sm:$0xff]   ;;  %v5079_v21 = vld [vmem:[#allocation2 + $0xa4] ss:$16 sps:$4 sm:$0xff]   ;;  %v5124_v53 = vld [vmem:[#allocation2 + $0x88] ss:$16 sps:$4 sm:$0xff]  }
  0x44   :  { %1622 = vmatpush1.bf16.msra.mxu1 %v5066_v12  ;;  %1494 = vmatprep.subr.bf16.mxu0 %v5067_v13  ;;  %v5081_v22 = vld [vmem:[#allocation2 + $0x6a4] ss:$16 sps:$4 sm:$0xff]   ;;  %v5083_v23 = vld [vmem:[#allocation2 + $0xa0] ss:$16 sps:$4 sm:$0xff]   ;;  %v5132_v56 = vld [vmem:[#allocation2 + $0xac] ss:$16 sps:$4 sm:$0xff]  }
  0x45   :  { %1623 = vmatprep.subr.bf16.mxu1 %v5069_v14  ;;  %v5084_v24 = vld [vmem:[#allocation2 + $0x6a0] ss:$16 sps:$4 sm:$0xff]   ;;  %v5085_v25 = vld [vmem:[#allocation2 + $0xc4] ss:$16 sps:$4 sm:$0xff]   ;;  %v5130_v57 = vld [vmem:[#allocation2 + $0xa8] ss:$16 sps:$4 sm:$0xff]  }
  0x46   :  { %v5087_v26 = vld [vmem:[#allocation2 + $0x6c4] ss:$16 sps:$4 sm:$0xff]   ;;  %v5089_v27 = vld [vmem:[#allocation2 + $0xc0] ss:$16 sps:$4 sm:$0xff]   ;;  %v5138_v60 = vld [vmem:[#allocation2 + $0xcc] ss:$16 sps:$4 sm:$0xff]  }
  0x47   :  { %1495 = vmatpush1.bf16.msra.mxu0 %v5071_v15  ;;  %v5090_v28 = vld [vmem:[#allocation2 + $0x6c0] ss:$16 sps:$4 sm:$0xff]   ;;  %v5091_v29 = vld [vmem:[#allocation2 + $0xe4] ss:$16 sps:$4 sm:$0xff]   ;;  %v5136_v61 = vld [vmem:[#allocation2 + $0xc8] ss:$16 sps:$4 sm:$0xff]  }
  0x48   :  { %1624 = vmatpush1.bf16.msra.mxu1 %v5072_v16  ;;  %1496 = vmatprep.subr.bf16.mxu0 %v5073_v17  ;;  %v5093_v30 = vld [vmem:[#allocation2 + $0x6e4] ss:$16 sps:$4 sm:$0xff]   ;;  %v5095_v31 = vld [vmem:[#allocation2 + $0xe0] ss:$16 sps:$4 sm:$0xff]   ;;  %v5144_v1 = vld [vmem:[#allocation2 + $0xec] ss:$16 sps:$4 sm:$0xff]  }
  0x49   :  { %1625 = vmatprep.subr.bf16.mxu1 %v5075_v18  ;;  %v5096_v32 = vld [vmem:[#allocation2 + $0x6e0] ss:$16 sps:$4 sm:$0xff]   ;;  %v5097_v33 = vld [vmem:[#allocation2 + $0x104] ss:$16 sps:$4 sm:$0xff]   ;;  %v5142_v2 = vld [vmem:[#allocation2 + $0xe8] ss:$16 sps:$4 sm:$0xff]  }
  0x4a   :  { %v5099_v35 = vld [vmem:[%s6299_s0 + $0x18] ss:$28 sps:$4 sm:$0xff]   ;;  %v5103_v37 = vld [vmem:[#allocation2 + $0x100] ss:$16 sps:$4 sm:$0xff]   ;;  %v5154_v5 = vld [vmem:[#allocation2 + $0x10c] ss:$16 sps:$4 sm:$0xff]  }
  0x4b   :  { %1497 = vmatpush1.bf16.msra.mxu0 %v5077_v19  ;;  %v5104_v38 = vld [vmem:[#allocation2 + $0x124] ss:$16 sps:$4 sm:$0xff]   ;;  %v5109_v41 = vld [vmem:[#allocation2 + $0x120] ss:$16 sps:$4 sm:$0xff]   ;;  %v5152_v8 = vld [vmem:[#allocation2 + $0x108] ss:$16 sps:$4 sm:$0xff]  }
  0x4c   :  { %1626 = vmatpush1.bf16.msra.mxu1 %v5078_v20  ;;  %1498 = vmatprep.subr.bf16.mxu0 %v5079_v21  ;;  %v5110_v42 = vld [vmem:[#allocation2 + $0x144] ss:$16 sps:$4 sm:$0xff]   ;;  %v5115_v45 = vld [vmem:[#allocation2 + $0x140] ss:$16 sps:$4 sm:$0xff]   ;;  %v5160_v10 = vld [vmem:[#allocation2 + $0x12c] ss:$16 sps:$4 sm:$0xff]  }
  0x4d   :  { %1627 = vmatprep.subr.bf16.mxu1 %v5081_v22  ;;  %v5116_v46 = vld [vmem:[#allocation2 + $0x164] ss:$16 sps:$4 sm:$0xff]   ;;  %v5121_v49 = vld [vmem:[#allocation2 + $0x160] ss:$16 sps:$4 sm:$0xff]   ;;  %v5158_v12 = vld [vmem:[#allocation2 + $0x128] ss:$16 sps:$4 sm:$0xff]  }
  0x4e   :  { %v5122_v50 = vld [vmem:[#allocation2 + $0x184] ss:$16 sps:$4 sm:$0xff]   ;;  %v5127_v54 = vld [vmem:[#allocation2 + $0x180] ss:$16 sps:$4 sm:$0xff]   ;;  %v5166_v14 = vld [vmem:[#allocation2 + $0x14c] ss:$16 sps:$4 sm:$0xff]  }
  0x4f   :  { %1499 = vmatpush1.bf16.msra.mxu0 %v5083_v23  ;;  %v5148_v51 = vld [vmem:[%s6299_s0 + $0x4] ss:$28 sps:$4 sm:$0xff]   ;;  %v5164_v16 = vld [vmem:[#allocation2 + $0x148] ss:$16 sps:$4 sm:$0xff]   ;;  %v5172_v18 = vld [vmem:[#allocation2 + $0x16c] ss:$16 sps:$4 sm:$0xff]  }
  0x50   :  { %1628 = vmatpush1.bf16.msra.mxu1 %v5084_v24  ;;  %1500 = vmatprep.subr.bf16.mxu0 %v5085_v25  ;;  %v5128_v55 = vld [vmem:[#allocation2 + $0x1a4] ss:$16 sps:$4 sm:$0xff]   ;;  %v5133_v58 = vld [vmem:[#allocation2 + $0x1a0] ss:$16 sps:$4 sm:$0xff]   ;;  %v5170_v20 = vld [vmem:[#allocation2 + $0x168] ss:$16 sps:$4 sm:$0xff]  }
  0x51   :  { %1629 = vmatprep.subr.bf16.mxu1 %v5087_v26  ;;  %1520 = vmatprep.mubr.bf16.mxu0 %v5148_v51  ;;  %v5134_v59 = vld [vmem:[#allocation2 + $0x1c4] ss:$16 sps:$4 sm:$0xff]   ;;  %v5139_v62 = vld [vmem:[#allocation2 + $0x1c0] ss:$16 sps:$4 sm:$0xff]   ;;  %v5178_v22 = vld [vmem:[#allocation2 + $0x18c] ss:$16 sps:$4 sm:$0xff]  }
  0x52   :  { %v5140_v63 = vld [vmem:[#allocation2 + $0x1e4] ss:$16 sps:$4 sm:$0xff]   ;;  %v5145_v3 = vld [vmem:[#allocation2 + $0x1e0] ss:$16 sps:$4 sm:$0xff]   ;;  %v5176_v24 = vld [vmem:[#allocation2 + $0x188] ss:$16 sps:$4 sm:$0xff]  }
  0x53   :  { %1501 = vmatpush1.bf16.msra.mxu0 %v5089_v27  ;;  %v5151_v4 = vld [vmem:[#allocation2 + $0x204] ss:$16 sps:$4 sm:$0xff]   ;;  %v6056_v6 = vld [vmem:[%s6299_s0] ss:$28 sps:$4 sm:$0xff]  }
  0x54   :  { %1630 = vmatpush1.bf16.msra.mxu1 %v5090_v28  ;;  %1502 = vmatprep.subr.bf16.mxu0 %v5091_v29  ;;  %v5149_v7 = vld [vmem:[#allocation2 + $0x200] ss:$16 sps:$4 sm:$0xff]   ;;  %v5157_v9 = vld [vmem:[#allocation2 + $0x224] ss:$16 sps:$4 sm:$0xff]   ;;  %v5184_v26 = vld [vmem:[#allocation2 + $0x1ac] ss:$16 sps:$4 sm:$0xff]  }
  0x55   :  { %1631 = vmatprep.subr.bf16.mxu1 %v5093_v30  ;;  %v5155_v11 = vld [vmem:[#allocation2 + $0x220] ss:$16 sps:$4 sm:$0xff]   ;;  %v5163_v13 = vld [vmem:[#allocation2 + $0x244] ss:$16 sps:$4 sm:$0xff]   ;;  %v5182_v28 = vld [vmem:[#allocation2 + $0x1a8] ss:$16 sps:$4 sm:$0xff]  }
  0x56   :  { %v5161_v15 = vld [vmem:[#allocation2 + $0x240] ss:$16 sps:$4 sm:$0xff]   ;;  %v5169_v17 = vld [vmem:[#allocation2 + $0x264] ss:$16 sps:$4 sm:$0xff]   ;;  %v5190_v30 = vld [vmem:[#allocation2 + $0x1cc] ss:$16 sps:$4 sm:$0xff]  }
  0x57   :  { %1503 = vmatpush1.bf16.msra.mxu0 %v5095_v31  ;;  %v5167_v19 = vld [vmem:[#allocation2 + $0x260] ss:$16 sps:$4 sm:$0xff]   ;;  %v5175_v21 = vld [vmem:[#allocation2 + $0x284] ss:$16 sps:$4 sm:$0xff]  }
  0x58   :  { %1632 = vmatpush1.bf16.msra.mxu1 %v5096_v32  ;;  %1504 = vmatprep.subr.bf16.mxu0 %v5097_v33  ;;  %v5173_v23 = vld [vmem:[#allocation2 + $0x280] ss:$16 sps:$4 sm:$0xff]   ;;  %v5181_v25 = vld [vmem:[#allocation2 + $0x2a4] ss:$16 sps:$4 sm:$0xff]   ;;  %v5188_v32 = vld [vmem:[#allocation2 + $0x1c8] ss:$16 sps:$4 sm:$0xff]  }
  0x59   :  { %1660 = vmatprep.subr.bf16.mxu1 %v5102_v34  ;;  %v5179_v27 = vld [vmem:[#allocation2 + $0x2a0] ss:$16 sps:$4 sm:$0xff]   ;;  %v5187_v29 = vld [vmem:[#allocation2 + $0x2c4] ss:$16 sps:$4 sm:$0xff]   ;;  %v5247_v34 = vld [vmem:[%s6299_s0 + $0xc] ss:$28 sps:$4 sm:$0xff]  }
  0x5a   :  { %v5185_v31 = vld [vmem:[#allocation2 + $0x2c0] ss:$16 sps:$4 sm:$0xff]   ;;  %v5193_v33 = vld [vmem:[#allocation2 + $0x2e4] ss:$16 sps:$4 sm:$0xff]  }
  0x5b   :  { %1650 = vmatmul.mubr.bf16.vlgmr.msra.gmra.mrb[0].mxu1 %v5099_v35  ;;  %1505 = vmatpush1.bf16.msra.mxu0 %v5103_v37  ;;  %v5196_v35 = vld [vmem:[#allocation2 + $0x1ec] ss:$16 sps:$4 sm:$0xff]   ;;  %v5194_v37 = vld [vmem:[#allocation2 + $0x1e8] ss:$16 sps:$4 sm:$0xff]  }
  0x5c   :  { %1661 = vmatpush1.bf16.msra.mxu1 %v5100_v36  ;;  %1506 = vmatprep.subr.bf16.mxu0 %v5104_v38  ;;  %v5191_v36 = vld [vmem:[#allocation2 + $0x2e0] ss:$16 sps:$4 sm:$0xff]   ;;  %v5199_v38 = vld [vmem:[#allocation2 + $0x304] ss:$16 sps:$4 sm:$0xff]  }
  0x5d   :  { %1662 = vmatprep.subr.bf16.mxu1 %v5108_v39  ;;  %1692 = vmatprep.mubr.bf16.mxu1 %v5148_v51  ;;  %v5202_v39 = vld [vmem:[#allocation2 + $0x20c] ss:$16 sps:$4 sm:$0xff]  }
  0x5e   :  { %v5220_v51 = vld [vmem:[#allocation2 + $0x26c] ss:$16 sps:$4 sm:$0xff]  }
  0x5f   :  { %1507 = vmatpush1.bf16.msra.mxu0 %v5109_v41  ;;  %v5200_v41 = vld [vmem:[#allocation2 + $0x208] ss:$16 sps:$4 sm:$0xff]  }
  0x60   :  { %1663 = vmatpush1.bf16.msra.mxu1 %v5106_v40  ;;  %1508 = vmatprep.subr.bf16.mxu0 %v5110_v42  ;;  %v5197_v40 = vld [vmem:[#allocation2 + $0x300] ss:$16 sps:$4 sm:$0xff]   ;;  %v5205_v42 = vld [vmem:[#allocation2 + $0x324] ss:$16 sps:$4 sm:$0xff]  }
  0x61   :  { %1664 = vmatprep.subr.bf16.mxu1 %v5114_v43  ;;  %v5208_v43 = vld [vmem:[#allocation2 + $0x22c] ss:$16 sps:$4 sm:$0xff]  }
  0x63   :  { %1509 = vmatpush1.bf16.msra.mxu0 %v5115_v45  ;;  %v5206_v45 = vld [vmem:[#allocation2 + $0x228] ss:$16 sps:$4 sm:$0xff]  }
  0x64   :  { %1665 = vmatpush1.bf16.msra.mxu1 %v5112_v44  ;;  %1510 = vmatprep.subr.bf16.mxu0 %v5116_v46  ;;  %v5203_v44 = vld [vmem:[#allocation2 + $0x320] ss:$16 sps:$4 sm:$0xff]   ;;  %v5211_v46 = vld [vmem:[#allocation2 + $0x344] ss:$16 sps:$4 sm:$0xff]  }
  0x65   :  { %1666 = vmatprep.subr.bf16.mxu1 %v5120_v47  ;;  %v5214_v47 = vld [vmem:[#allocation2 + $0x24c] ss:$16 sps:$4 sm:$0xff]  }
  0x67   :  { %1511 = vmatpush1.bf16.msra.mxu0 %v5121_v49  ;;  %v5212_v49 = vld [vmem:[#allocation2 + $0x248] ss:$16 sps:$4 sm:$0xff]  }
  0x68   :  { %1667 = vmatpush1.bf16.msra.mxu1 %v5118_v48  ;;  %1512 = vmatprep.subr.bf16.mxu0 %v5122_v50  ;;  %v5209_v48 = vld [vmem:[#allocation2 + $0x340] ss:$16 sps:$4 sm:$0xff]   ;;  %v5217_v50 = vld [vmem:[#allocation2 + $0x364] ss:$16 sps:$4 sm:$0xff]  }
  0x69   :  { %1668 = vmatprep.subr.bf16.mxu1 %v5126_v52  ;;  %v5215_v52 = vld [vmem:[#allocation2 + $0x360] ss:$16 sps:$4 sm:$0xff]  }
  0x6b   :  { %1513 = vmatpush1.bf16.msra.mxu0 %v5127_v54  ;;  %v5223_v54 = vld [vmem:[#allocation2 + $0x384] ss:$16 sps:$4 sm:$0xff]  }
  0x6c   :  { %1669 = vmatpush1.bf16.msra.mxu1 %v5124_v53  ;;  %1514 = vmatprep.subr.bf16.mxu0 %v5128_v55  ;;  %v5218_v53 = vld [vmem:[#allocation2 + $0x268] ss:$16 sps:$4 sm:$0xff]   ;;  %v5226_v55 = vld [vmem:[#allocation2 + $0x28c] ss:$16 sps:$4 sm:$0xff]  }
  0x6d   :  { %1670 = vmatprep.subr.bf16.mxu1 %v5132_v56  ;;  %v5221_v56 = vld [vmem:[#allocation2 + $0x380] ss:$16 sps:$4 sm:$0xff]  }
  0x6f   :  { %1515 = vmatpush1.bf16.msra.mxu0 %v5133_v58  ;;  %v5229_v58 = vld [vmem:[#allocation2 + $0x3a4] ss:$16 sps:$4 sm:$0xff]  }
  0x70   :  { %1671 = vmatpush1.bf16.msra.mxu1 %v5130_v57  ;;  %1516 = vmatprep.subr.bf16.mxu0 %v5134_v59  ;;  %v5224_v57 = vld [vmem:[#allocation2 + $0x288] ss:$16 sps:$4 sm:$0xff]   ;;  %v5232_v59 = vld [vmem:[#allocation2 + $0x2ac] ss:$16 sps:$4 sm:$0xff]  }
  0x71   :  { %1672 = vmatprep.subr.bf16.mxu1 %v5138_v60  ;;  %v5227_v60 = vld [vmem:[#allocation2 + $0x3a0] ss:$16 sps:$4 sm:$0xff]  }
  0x73   :  { %1517 = vmatpush1.bf16.msra.mxu0 %v5139_v62  ;;  %v5235_v62 = vld [vmem:[#allocation2 + $0x3c4] ss:$16 sps:$4 sm:$0xff]  }
  0x74   :  { %1673 = vmatpush1.bf16.msra.mxu1 %v5136_v61  ;;  %1518 = vmatprep.subr.bf16.mxu0 %v5140_v63  ;;  %v5230_v61 = vld [vmem:[#allocation2 + $0x2a8] ss:$16 sps:$4 sm:$0xff]   ;;  %v5238_v63 = vld [vmem:[#allocation2 + $0x2cc] ss:$16 sps:$4 sm:$0xff]  }
  0x75   :  { %1674 = vmatprep.subr.bf16.mxu1 %v5144_v1  ;;  %v5233_v1 = vld [vmem:[#allocation2 + $0x3c0] ss:$16 sps:$4 sm:$0xff]  }
  0x77   :  { %1519 = vmatpush1.bf16.msra.mxu0 %v5145_v3  ;;  %v5241_v3 = vld [vmem:[#allocation2 + $0x3e4] ss:$16 sps:$4 sm:$0xff]  }
  0x78   :  { %1675 = vmatpush1.bf16.msra.mxu1 %v5142_v2  ;;  %1531 = vmatprep.subr.bf16.mxu0 %v5151_v4  ;;  %v5236_v2 = vld [vmem:[#allocation2 + $0x2c8] ss:$16 sps:$4 sm:$0xff]   ;;  %v5244_v4 = vld [vmem:[#allocation2 + $0x2ec] ss:$16 sps:$4 sm:$0xff]  }
  0x79   :  { %1676 = vmatprep.subr.bf16.mxu1 %v5154_v5  ;;  %v5239_v5 = vld [vmem:[#allocation2 + $0x3e0] ss:$16 sps:$4 sm:$0xff]  }
  0x7a   :  { %1521 = vmatmul.mubr.bf16.vlgmr.msra.gmra.mrb[0].mxu0 %v6056_v6 }
  0x7b   :  { %1532 = vmatpush1.bf16.msra.mxu0 %v5149_v7  ;;  %1563 = vmatprep.mubr.bf16.mxu0 %v5247_v34  ;;  %v5250_v7 = vld [vmem:[#allocation2 + $0x404] ss:$16 sps:$4 sm:$0xff]  }
  0x7c   :  { %1677 = vmatpush1.bf16.msra.mxu1 %v5152_v8  ;;  %1533 = vmatprep.subr.bf16.mxu0 %v5157_v9  ;;  %v5253_v8 = vld [vmem:[#allocation2 + $0x30c] ss:$16 sps:$4 sm:$0xff]   ;;  %v6066_v9 = vld [vmem:[%s6299_s0 + $0x8] ss:$28 sps:$4 sm:$0xff]  }
  0x7d   :  { %1678 = vmatprep.subr.bf16.mxu1 %v5160_v10  ;;  %v5248_v10 = vld [vmem:[#allocation2 + $0x400] ss:$16 sps:$4 sm:$0xff]  }
  0x7f   :  { %1534 = vmatpush1.bf16.msra.mxu0 %v5155_v11  ;;  %v5251_v11 = vld [vmem:[#allocation2 + $0x308] ss:$16 sps:$4 sm:$0xff]  }
  0x80   :  { %1679 = vmatpush1.bf16.msra.mxu1 %v5158_v12  ;;  %1535 = vmatprep.subr.bf16.mxu0 %v5163_v13  ;;  %v5256_v12 = vld [vmem:[#allocation2 + $0x424] ss:$16 sps:$4 sm:$0xff]   ;;  %v5259_v13 = vld [vmem:[#allocation2 + $0x32c] ss:$16 sps:$4 sm:$0xff]  }
  0x81   :  { %1680 = vmatprep.subr.bf16.mxu1 %v5166_v14  ;;  %v5254_v14 = vld [vmem:[#allocation2 + $0x420] ss:$16 sps:$4 sm:$0xff]  }
  0x83   :  { %1536 = vmatpush1.bf16.msra.mxu0 %v5161_v15  ;;  %v5257_v15 = vld [vmem:[#allocation2 + $0x328] ss:$16 sps:$4 sm:$0xff]  }
  0x84   :  { %1681 = vmatpush1.bf16.msra.mxu1 %v5164_v16  ;;  %1537 = vmatprep.subr.bf16.mxu0 %v5169_v17  ;;  %v5262_v16 = vld [vmem:[#allocation2 + $0x444] ss:$16 sps:$4 sm:$0xff]  }
  0x85   :  { %1682 = vmatprep.subr.bf16.mxu1 %v5172_v18  ;;  %v6072_v17 = vld [vmem:[%s6299_s0 + $0x14] ss:$28 sps:$4 sm:$0xff]   ;;  %v5265_v18 = vld [vmem:[#allocation2 + $0x34c] ss:$16 sps:$4 sm:$0xff]  }
  0x87   :  { %1538 = vmatpush1.bf16.msra.mxu0 %v5167_v19  ;;  %v5260_v19 = vld [vmem:[#allocation2 + $0x440] ss:$16 sps:$4 sm:$0xff]  }
  0x88   :  { %1683 = vmatpush1.bf16.msra.mxu1 %v5170_v20  ;;  %1539 = vmatprep.subr.bf16.mxu0 %v5175_v21  ;;  %v5263_v20 = vld [vmem:[#allocation2 + $0x348] ss:$16 sps:$4 sm:$0xff]   ;;  %v5268_v21 = vld [vmem:[#allocation2 + $0x464] ss:$16 sps:$4 sm:$0xff]  }
  0x89   :  { %1684 = vmatprep.subr.bf16.mxu1 %v5178_v22  ;;  %v5271_v22 = vld [vmem:[#allocation2 + $0x36c] ss:$16 sps:$4 sm:$0xff]  }
  0x8b   :  { %1540 = vmatpush1.bf16.msra.mxu0 %v5173_v23  ;;  %v5266_v23 = vld [vmem:[#allocation2 + $0x460] ss:$16 sps:$4 sm:$0xff]  }
  0x8c   :  { %1685 = vmatpush1.bf16.msra.mxu1 %v5176_v24  ;;  %1541 = vmatprep.subr.bf16.mxu0 %v5181_v25  ;;  %v5269_v24 = vld [vmem:[#allocation2 + $0x368] ss:$16 sps:$4 sm:$0xff]   ;;  %v5274_v25 = vld [vmem:[#allocation2 + $0x484] ss:$16 sps:$4 sm:$0xff]  }
  0x8d   :  { %1686 = vmatprep.subr.bf16.mxu1 %v5184_v26  ;;  %v5277_v26 = vld [vmem:[#allocation2 + $0x38c] ss:$16 sps:$4 sm:$0xff]  }
  0x8f   :  { %1542 = vmatpush1.bf16.msra.mxu0 %v5179_v27  ;;  %v5272_v27 = vld [vmem:[#allocation2 + $0x480] ss:$16 sps:$4 sm:$0xff]  }
  0x90   :  { %1687 = vmatpush1.bf16.msra.mxu1 %v5182_v28  ;;  %1543 = vmatprep.subr.bf16.mxu0 %v5187_v29  ;;  %v5275_v28 = vld [vmem:[#allocation2 + $0x388] ss:$16 sps:$4 sm:$0xff]   ;;  %v5280_v29 = vld [vmem:[#allocation2 + $0x4a4] ss:$16 sps:$4 sm:$0xff]  }
  0x91   :  { %1688 = vmatprep.subr.bf16.mxu1 %v5190_v30  ;;  %v5283_v30 = vld [vmem:[#allocation2 + $0x3ac] ss:$16 sps:$4 sm:$0xff]  }
  0x93   :  { %1544 = vmatpush1.bf16.msra.mxu0 %v5185_v31  ;;  %v5278_v31 = vld [vmem:[#allocation2 + $0x4a0] ss:$16 sps:$4 sm:$0xff]  }
  0x94   :  { %1689 = vmatpush1.bf16.msra.mxu1 %v5188_v32  ;;  %1545 = vmatprep.subr.bf16.mxu0 %v5193_v33  ;;  %v5281_v32 = vld [vmem:[#allocation2 + $0x3a8] ss:$16 sps:$4 sm:$0xff]   ;;  %v5286_v33 = vld [vmem:[#allocation2 + $0x4c4] ss:$16 sps:$4 sm:$0xff]  }
  0x95   :  { %1690 = vmatprep.subr.bf16.mxu1 %v5196_v35  ;;  %v5284_v35 = vld [vmem:[#allocation2 + $0x4c0] ss:$16 sps:$4 sm:$0xff]  }
  0x97   :  { %1546 = vmatpush1.bf16.msra.mxu0 %v5191_v36  ;;  %v5287_v36 = vld [vmem:[#allocation2 + $0x3c8] ss:$16 sps:$4 sm:$0xff]  }
  0x98   :  { %1691 = vmatpush1.bf16.msra.mxu1 %v5194_v37  ;;  %1547 = vmatprep.subr.bf16.mxu0 %v5199_v38  ;;  %v5292_v37 = vld [vmem:[#allocation2 + $0x4e4] ss:$16 sps:$4 sm:$0xff]   ;;  %v5295_v38 = vld [vmem:[#allocation2 + $0x3ec] ss:$16 sps:$4 sm:$0xff]  }
  0x99   :  { %1703 = vmatprep.subr.bf16.mxu1 %v5202_v39  ;;  %v5290_v39 = vld [vmem:[#allocation2 + $0x4e0] ss:$16 sps:$4 sm:$0xff]  }
  0x9b   :  { %1693 = vmatmul.mubr.bf16.vlgmr.msra.gmra.mrb[4].mxu1 %v6056_v6  ;;  %1548 = vmatpush1.bf16.msra.mxu0 %v5197_v40  ;;  %v5242_v6 = vld [vmem:[#allocation2 + $0x2e8] ss:$16 sps:$4 sm:$0xff]  }
  0x9c   :  { %1704 = vmatpush1.bf16.msra.mxu1 %v5200_v41  ;;  %1549 = vmatprep.subr.bf16.mxu0 %v5205_v42  ;;  %v5293_v40 = vld [vmem:[#allocation2 + $0x3e8] ss:$16 sps:$4 sm:$0xff]   ;;  %v5298_v41 = vld [vmem:[#allocation2 + $0x504] ss:$16 sps:$4 sm:$0xff]   ;;  %v5301_v42 = vld [vmem:[#allocation2 + $0x40c] ss:$16 sps:$4 sm:$0xff]  }
  0x9d   :  { %1705 = vmatprep.subr.bf16.mxu1 %v5208_v43  ;;  %1735 = vmatprep.mubr.bf16.mxu1 %v5247_v34  ;;  %v5289_v34 = vld [vmem:[#allocation2 + $0x3cc] ss:$16 sps:$4 sm:$0xff]   ;;  %v5296_v43 = vld [vmem:[#allocation2 + $0x500] ss:$16 sps:$4 sm:$0xff]  }
  0x9f   :  { %1550 = vmatpush1.bf16.msra.mxu0 %v5203_v44  ;;  %v5299_v44 = vld [vmem:[#allocation2 + $0x408] ss:$16 sps:$4 sm:$0xff]  }
  0xa0   :  { %1706 = vmatpush1.bf16.msra.mxu1 %v5206_v45  ;;  %1551 = vmatprep.subr.bf16.mxu0 %v5211_v46  ;;  %v5304_v45 = vld [vmem:[#allocation2 + $0x524] ss:$16 sps:$4 sm:$0xff]   ;;  %v5307_v46 = vld [vmem:[#allocation2 + $0x42c] ss:$16 sps:$4 sm:$0xff]  }
  0xa1   :  { %1707 = vmatprep.subr.bf16.mxu1 %v5214_v47  ;;  %v5302_v47 = vld [vmem:[#allocation2 + $0x520] ss:$16 sps:$4 sm:$0xff]  }
  0xa3   :  { %1552 = vmatpush1.bf16.msra.mxu0 %v5209_v48  ;;  %v5305_v48 = vld [vmem:[#allocation2 + $0x428] ss:$16 sps:$4 sm:$0xff]  }
  0xa4   :  { %1708 = vmatpush1.bf16.msra.mxu1 %v5212_v49  ;;  %1553 = vmatprep.subr.bf16.mxu0 %v5217_v50  ;;  %v5310_v49 = vld [vmem:[#allocation2 + $0x544] ss:$16 sps:$4 sm:$0xff]   ;;  %v5313_v50 = vld [vmem:[#allocation2 + $0x44c] ss:$16 sps:$4 sm:$0xff]  }
  0xa5   :  { %1709 = vmatprep.subr.bf16.mxu1 %v5220_v51  ;;  %v5308_v51 = vld [vmem:[#allocation2 + $0x540] ss:$16 sps:$4 sm:$0xff]  }
  0xa7   :  { %1554 = vmatpush1.bf16.msra.mxu0 %v5215_v52  ;;  %v5311_v52 = vld [vmem:[#allocation2 + $0x448] ss:$16 sps:$4 sm:$0xff]  }
  0xa8   :  { %1710 = vmatpush1.bf16.msra.mxu1 %v5218_v53  ;;  %1555 = vmatprep.subr.bf16.mxu0 %v5223_v54  ;;  %v5316_v53 = vld [vmem:[#allocation2 + $0x564] ss:$16 sps:$4 sm:$0xff]   ;;  %v5319_v54 = vld [vmem:[#allocation2 + $0x46c] ss:$16 sps:$4 sm:$0xff]  }
  0xa9   :  { %1711 = vmatprep.subr.bf16.mxu1 %v5226_v55  ;;  %v5314_v55 = vld [vmem:[#allocation2 + $0x560] ss:$16 sps:$4 sm:$0xff]  }
  0xab   :  { %1556 = vmatpush1.bf16.msra.mxu0 %v5221_v56  ;;  %v5317_v56 = vld [vmem:[#allocation2 + $0x468] ss:$16 sps:$4 sm:$0xff]  }
  0xac   :  { %1712 = vmatpush1.bf16.msra.mxu1 %v5224_v57  ;;  %1557 = vmatprep.subr.bf16.mxu0 %v5229_v58  ;;  %v5322_v57 = vld [vmem:[#allocation2 + $0x584] ss:$16 sps:$4 sm:$0xff]   ;;  %v5325_v58 = vld [vmem:[#allocation2 + $0x48c] ss:$16 sps:$4 sm:$0xff]  }
  0xad   :  { %1713 = vmatprep.subr.bf16.mxu1 %v5232_v59  ;;  %v5320_v59 = vld [vmem:[#allocation2 + $0x580] ss:$16 sps:$4 sm:$0xff]  }
  0xaf   :  { %1558 = vmatpush1.bf16.msra.mxu0 %v5227_v60  ;;  %v5323_v60 = vld [vmem:[#allocation2 + $0x488] ss:$16 sps:$4 sm:$0xff]  }
  0xb0   :  { %1714 = vmatpush1.bf16.msra.mxu1 %v5230_v61  ;;  %1559 = vmatprep.subr.bf16.mxu0 %v5235_v62  ;;  %v5328_v61 = vld [vmem:[#allocation2 + $0x5a4] ss:$16 sps:$4 sm:$0xff]   ;;  %v5331_v62 = vld [vmem:[#allocation2 + $0x4ac] ss:$16 sps:$4 sm:$0xff]  }
  0xb1   :  { %1715 = vmatprep.subr.bf16.mxu1 %v5238_v63  ;;  %v5326_v63 = vld [vmem:[#allocation2 + $0x5a0] ss:$16 sps:$4 sm:$0xff]  }
  0xb3   :  { %1560 = vmatpush1.bf16.msra.mxu0 %v5233_v1  ;;  %v5329_v1 = vld [vmem:[#allocation2 + $0x4a8] ss:$16 sps:$4 sm:$0xff]  }
  0xb4   :  { %1716 = vmatpush1.bf16.msra.mxu1 %v5236_v2  ;;  %1561 = vmatprep.subr.bf16.mxu0 %v5241_v3  ;;  %v5334_v2 = vld [vmem:[#allocation2 + $0x5c4] ss:$16 sps:$4 sm:$0xff]   ;;  %v5337_v3 = vld [vmem:[#allocation2 + $0x4cc] ss:$16 sps:$4 sm:$0xff]  }
  0xb5   :  { %1717 = vmatprep.subr.bf16.mxu1 %v5244_v4  ;;  %v5332_v4 = vld [vmem:[#allocation2 + $0x5c0] ss:$16 sps:$4 sm:$0xff]  }
  0xb7   :  { %1562 = vmatpush1.bf16.msra.mxu0 %v5239_v5  ;;  %v5335_v5 = vld [vmem:[#allocation2 + $0x4c8] ss:$16 sps:$4 sm:$0xff]  }
  0xb8   :  { %1718 = vmatpush1.bf16.msra.mxu1 %v5242_v6  ;;  %1574 = vmatprep.subr.bf16.mxu0 %v5250_v7  ;;  %v5340_v6 = vld [vmem:[#allocation2 + $0x5e4] ss:$16 sps:$4 sm:$0xff]   ;;  %v5343_v7 = vld [vmem:[#allocation2 + $0x4ec] ss:$16 sps:$4 sm:$0xff]  }
  0xb9   :  { %1719 = vmatprep.subr.bf16.mxu1 %v5253_v8  ;;  %v1856_v8 = vld [vmem:[#allocation5 + $0x80] sm:$0xff] }
  0xba   :  { %1564 = vmatmul.mubr.bf16.vlgmr.msra.gmra.mrb[0].mxu0 %v6066_v9 }
  0xbb   :  { %1575 = vmatpush1.bf16.msra.mxu0 %v5248_v10  ;;  %1606 = vmatprep.mubr.bf16.mxu0 %v6072_v17  ;;  %v5338_v10 = vld [vmem:[#allocation2 + $0x5e0] ss:$16 sps:$4 sm:$0xff]  }
  0xbc   :  { %1720 = vmatpush1.bf16.msra.mxu1 %v5251_v11  ;;  %1576 = vmatprep.subr.bf16.mxu0 %v5256_v12  ;;  %v5341_v11 = vld [vmem:[#allocation2 + $0x4e8] ss:$16 sps:$4 sm:$0xff]   ;;  %v5349_v12 = vld [vmem:[#allocation2 + $0x50c] ss:$16 sps:$4 sm:$0xff]  }
  0xbd   :  { %1721 = vmatprep.subr.bf16.mxu1 %v5259_v13  ;;  %v1840_v13 = vld [vmem:[#allocation5] sm:$0xff] }
  0xbf   :  { %1577 = vmatpush1.bf16.msra.mxu0 %v5254_v14  ;;  %v1841_v14 = vld [vmem:[#allocation5 + $0x8] sm:$0xff] }
  0xc0   :  { %1722 = vmatpush1.bf16.msra.mxu1 %v5257_v15  ;;  %1578 = vmatprep.subr.bf16.mxu0 %v5262_v16  ;;  %v1858_v15 = vld [vmem:[#allocation5 + $0x90] sm:$0xff]  ;;  %v1859_v16 = vld [vmem:[#allocation5 + $0x98] sm:$0xff] }
  0xc1   :  { %1723 = vmatprep.subr.bf16.mxu1 %v5265_v18 }
  0xc3   :  { %1579 = vmatpush1.bf16.msra.mxu0 %v5260_v19  ;;  %v5347_v19 = vld [vmem:[#allocation2 + $0x508] ss:$16 sps:$4 sm:$0xff]  }
  0xc4   :  { %1724 = vmatpush1.bf16.msra.mxu1 %v5263_v20  ;;  %1580 = vmatprep.subr.bf16.mxu0 %v5268_v21  ;;  %v5352_v20 = vld [vmem:[#allocation2 + $0x52c] ss:$16 sps:$4 sm:$0xff]   ;;  %v1842_v21 = vld [vmem:[#allocation5 + $0x10] sm:$0xff] }
  0xc5   :  { %1725 = vmatprep.subr.bf16.mxu1 %v5271_v22  ;;  %v1843_v22 = vld [vmem:[#allocation5 + $0x18] sm:$0xff] }
  0xc7   :  { %1581 = vmatpush1.bf16.msra.mxu0 %v5266_v23  ;;  %v4917_v23 = vpack.c.bf16 %v1841_v14, %v1840_v13  ;;  %v5389_v14 = vld [vmem:[#allocation2 + $0x6c8] ss:$16 sps:$4 sm:$0xff]  }
  0xc8   :  { %1726 = vmatpush1.bf16.msra.mxu1 %v5269_v24  ;;  %1582 = vmatprep.subr.bf16.mxu0 %v5274_v25  ;;  %v1860_v24 = vld [vmem:[#allocation5 + $0xa0] sm:$0xff]  ;;  %v1861_v25 = vld [vmem:[#allocation5 + $0xa8] sm:$0xff] }
  0xc9   :  { %1727 = vmatprep.subr.bf16.mxu1 %v5277_v26  ;;  %v4919_v26 = vpack.c.bf16 %v1859_v16, %v1858_v15  ;;  %v5394_v16 = vld [vmem:[#allocation2 + $0x6ec] ss:$16 sps:$4 sm:$0xff]  }
  0xcb   :  { %1583 = vmatpush1.bf16.msra.mxu0 %v5272_v27  ;;  %v5350_v27 = vld [vmem:[#allocation2 + $0x528] ss:$16 sps:$4 sm:$0xff]  }
  0xcc   :  { %1728 = vmatpush1.bf16.msra.mxu1 %v5275_v28  ;;  %1584 = vmatprep.subr.bf16.mxu0 %v5280_v29  ;;  %v5355_v28 = vld [vmem:[#allocation2 + $0x54c] ss:$16 sps:$4 sm:$0xff]   ;;  %v1844_v29 = vld [vmem:[#allocation5 + $0x20] sm:$0xff] }
  0xcd   :  { %1729 = vmatprep.subr.bf16.mxu1 %v5283_v30  ;;  %v1845_v30 = vld [vmem:[#allocation5 + $0x28] sm:$0xff] }
  0xcf   :  { %1585 = vmatpush1.bf16.msra.mxu0 %v5278_v31  ;;  %v4921_v31 = vpack.c.bf16 %v1843_v22, %v1842_v21  ;;  %v1868_v21 = vld [vmem:[#allocation5 + $0xe0] sm:$0xff]  ;;  %v1869_v22 = vld [vmem:[#allocation5 + $0xe8] sm:$0xff] }
  0xd0   :  { %1730 = vmatpush1.bf16.msra.mxu1 %v5281_v32  ;;  %1586 = vmatprep.subr.bf16.mxu0 %v5286_v33  ;;  %v1862_v32 = vld [vmem:[#allocation5 + $0xb0] sm:$0xff]  ;;  %v1863_v33 = vld [vmem:[#allocation5 + $0xb8] sm:$0xff] }
  0xd1   :  { %1731 = vmatprep.subr.bf16.mxu1 %v5289_v34  ;;  %v4923_v34 = vpack.c.bf16 %v1861_v25, %v1860_v24  ;;  %v1852_v24 = vld [vmem:[#allocation5 + $0x60] sm:$0xff]  ;;  %v1853_v25 = vld [vmem:[#allocation5 + $0x68] sm:$0xff] }
  0xd3   :  { %1587 = vmatpush1.bf16.msra.mxu0 %v5284_v35  ;;  %v5353_v35 = vld [vmem:[#allocation2 + $0x548] ss:$16 sps:$4 sm:$0xff]  }
  0xd4   :  { %1732 = vmatpush1.bf16.msra.mxu1 %v5287_v36  ;;  %1588 = vmatprep.subr.bf16.mxu0 %v5292_v37  ;;  %v5358_v36 = vld [vmem:[#allocation2 + $0x56c] ss:$16 sps:$4 sm:$0xff]   ;;  %v1846_v37 = vld [vmem:[#allocation5 + $0x30] sm:$0xff] }
  0xd5   :  { %1733 = vmatprep.subr.bf16.mxu1 %v5295_v38  ;;  %v1847_v38 = vld [vmem:[#allocation5 + $0x38] sm:$0xff] }
  0xd7   :  { %1589 = vmatpush1.bf16.msra.mxu0 %v5290_v39  ;;  %v4925_v39 = vpack.c.bf16 %v1845_v30, %v1844_v29  ;;  %v1854_v30 = vld [vmem:[#allocation5 + $0x70] sm:$0xff] }
  0xd8   :  { %1734 = vmatpush1.bf16.msra.mxu1 %v5293_v40  ;;  %1590 = vmatprep.subr.bf16.mxu0 %v5298_v41  ;;  %v1864_v40 = vld [vmem:[#allocation5 + $0xc0] sm:$0xff]  ;;  %v1865_v41 = vld [vmem:[#allocation5 + $0xc8] sm:$0xff] }
  0xd9   :  { %1746 = vmatprep.subr.bf16.mxu1 %v5301_v42  ;;  %v4927_v42 = vpack.c.bf16 %v1863_v33, %v1862_v32  ;;  %v1888_v33 = vld [vmem:[#allocation5 + $0x180] sm:$0xff] }
  0xdb   :  { %1736 = vmatmul.mubr.bf16.vlgmr.msra.gmra.mrb[4].mxu1 %v6066_v9  ;;  %1591 = vmatpush1.bf16.msra.mxu0 %v5296_v43  ;;  %v1857_v9 = vld [vmem:[#allocation5 + $0x88] sm:$0xff] }
  0xdc   :  { %1747 = vmatpush1.bf16.msra.mxu1 %v5299_v44  ;;  %1592 = vmatprep.subr.bf16.mxu0 %v5304_v45  ;;  %v4915_v18 = vpack.c.bf16 %v1857_v9, %v1856_v8  ;;  %v5356_v43 = vld [vmem:[#allocation2 + $0x568] ss:$16 sps:$4 sm:$0xff]   ;;  %v5361_v44 = vld [vmem:[#allocation2 + $0x58c] ss:$16 sps:$4 sm:$0xff]   ;;  %v1848_v45 = vld [vmem:[#allocation5 + $0x40] sm:$0xff] }
  0xdd   :  { %1748 = vmatprep.subr.bf16.mxu1 %v5307_v46  ;;  %1778 = vmatprep.mubr.bf16.mxu1 %v6072_v17  ;;  %v6080_v17 = vld [vmem:[%s6299_s0 + $0x10] ss:$28 sps:$4 sm:$0xff]   ;;  %v1849_v46 = vld [vmem:[#allocation5 + $0x48] sm:$0xff] }
  0xde   :  { %v5385_v8 = vld [vmem:[#allocation2 + $0x68c] ss:$16 sps:$4 sm:$0xff]   ;;  %v5383_v9 = vld [vmem:[#allocation2 + $0x688] ss:$16 sps:$4 sm:$0xff]  }
  0xdf   :  { %1593 = vmatpush1.bf16.msra.mxu0 %v5302_v47  ;;  %v4929_v47 = vpack.c.bf16 %v1847_v38, %v1846_v37  ;;  %v1873_v37 = vld [vmem:[#allocation5 + $0x108] sm:$0xff]  ;;  %v1890_v38 = vld [vmem:[#allocation5 + $0x190] sm:$0xff] }
  0xe0   :  { %1749 = vmatpush1.bf16.msra.mxu1 %v5305_v48  ;;  %1594 = vmatprep.subr.bf16.mxu0 %v5310_v49  ;;  %v1866_v48 = vld [vmem:[#allocation5 + $0xd0] sm:$0xff]  ;;  %v1867_v49 = vld [vmem:[#allocation5 + $0xd8] sm:$0xff] }
  0xe1   :  { %1750 = vmatprep.subr.bf16.mxu1 %v5313_v50  ;;  %v4931_v50 = vpack.c.bf16 %v1865_v41, %v1864_v40 }
  0xe3   :  { %1595 = vmatpush1.bf16.msra.mxu0 %v5308_v51  ;;  %v5359_v51 = vld [vmem:[#allocation2 + $0x588] ss:$16 sps:$4 sm:$0xff]  }
  0xe4   :  { %1751 = vmatpush1.bf16.msra.mxu1 %v5311_v52  ;;  %1596 = vmatprep.subr.bf16.mxu0 %v5316_v53  ;;  %v5364_v52 = vld [vmem:[#allocation2 + $0x5ac] ss:$16 sps:$4 sm:$0xff]   ;;  %v1850_v53 = vld [vmem:[#allocation5 + $0x50] sm:$0xff] }
  0xe5   :  { %1752 = vmatprep.subr.bf16.mxu1 %v5319_v54  ;;  %v1851_v54 = vld [vmem:[#allocation5 + $0x58] sm:$0xff] }
  0xe7   :  { %1597 = vmatpush1.bf16.msra.mxu0 %v5314_v55  ;;  %v4933_v55 = vpack.c.bf16 %v1849_v46, %v1848_v45  ;;  %v1893_v45 = vld [vmem:[#allocation5 + $0x1a8] sm:$0xff] }
  0xe8   :  { %1753 = vmatpush1.bf16.msra.mxu1 %v5317_v56  ;;  %1598 = vmatprep.subr.bf16.mxu0 %v5322_v57  ;;  %v4935_v56 = vpack.c.bf16 %v1867_v49, %v1866_v48  ;;  %v5362_v57 = vld [vmem:[#allocation2 + $0x5a8] ss:$16 sps:$4 sm:$0xff]   ;;  %v1876_v48 = vld [vmem:[#allocation5 + $0x120] sm:$0xff] }
  0xe9   :  { %1754 = vmatprep.subr.bf16.mxu1 %v5325_v58  ;;  %v5367_v58 = vld [vmem:[#allocation2 + $0x5cc] ss:$16 sps:$4 sm:$0xff]  }
  0xea   :  { %v1877_v49 = vld [vmem:[#allocation5 + $0x128] sm:$0xff] }
  0xeb   :  { %1599 = vmatpush1.bf16.msra.mxu0 %v5320_v59  ;;  %v4937_v59 = vpack.c.bf16 %v1851_v54, %v1850_v53  ;;  %v1878_v54 = vld [vmem:[#allocation5 + $0x130] sm:$0xff] }
  0xec   :  { %1755 = vmatpush1.bf16.msra.mxu1 %v5323_v60  ;;  %1600 = vmatprep.subr.bf16.mxu0 %v5328_v61  ;;  %v5365_v60 = vld [vmem:[#allocation2 + $0x5c8] ss:$16 sps:$4 sm:$0xff]   ;;  %v5370_v61 = vld [vmem:[#allocation2 + $0x5ec] ss:$16 sps:$4 sm:$0xff]  }
  0xed   :  { %1756 = vmatprep.subr.bf16.mxu1 %v5331_v62  ;;  %v5368_v62 = vld [vmem:[#allocation2 + $0x5e8] ss:$16 sps:$4 sm:$0xff]  }
  0xef   :  { %1601 = vmatpush1.bf16.msra.mxu0 %v5326_v63  ;;  %v5373_v63 = vld [vmem:[#allocation2 + $0x60c] ss:$16 sps:$4 sm:$0xff]  }
  0xf0   :  { %1757 = vmatpush1.bf16.msra.mxu1 %v5329_v1  ;;  %1602 = vmatprep.subr.bf16.mxu0 %v5334_v2  ;;  %v5371_v1 = vld [vmem:[#allocation2 + $0x608] ss:$16 sps:$4 sm:$0xff]   ;;  %v5376_v2 = vld [vmem:[#allocation2 + $0x62c] ss:$16 sps:$4 sm:$0xff]  }
  0xf1   :  { %1758 = vmatprep.subr.bf16.mxu1 %v5337_v3  ;;  %v5374_v3 = vld [vmem:[#allocation2 + $0x628] ss:$16 sps:$4 sm:$0xff]  }
  0xf3   :  { %1603 = vmatpush1.bf16.msra.mxu0 %v5332_v4  ;;  %v5379_v4 = vld [vmem:[#allocation2 + $0x64c] ss:$16 sps:$4 sm:$0xff]  }
  0xf4   :  { %1759 = vmatpush1.bf16.msra.mxu1 %v5335_v5  ;;  %1604 = vmatprep.subr.bf16.mxu0 %v5340_v6  ;;  %v5377_v5 = vld [vmem:[#allocation2 + $0x648] ss:$16 sps:$4 sm:$0xff]   ;;  %v5382_v6 = vld [vmem:[#allocation2 + $0x66c] ss:$16 sps:$4 sm:$0xff]  }
  0xf5   :  { %1760 = vmatprep.subr.bf16.mxu1 %v5343_v7  ;;  %v5380_v7 = vld [vmem:[#allocation2 + $0x668] ss:$16 sps:$4 sm:$0xff]  }
  0xf7   :  { %1605 = vmatpush1.bf16.msra.mxu0 %v5338_v10  ;;  %v5388_v10 = vld [vmem:[#allocation2 + $0x6ac] ss:$16 sps:$4 sm:$0xff]  }
  0xf8   :  { %1761 = vmatpush1.bf16.msra.mxu1 %v5341_v11  ;;  %4916 = vmatprep.subr.bf16.mxu0 %v4915_v18  ;;  %v5386_v11 = vld [vmem:[#allocation2 + $0x6a8] ss:$16 sps:$4 sm:$0xff]  }
  0xf9   :  { %1762 = vmatprep.subr.bf16.mxu1 %v5349_v12  ;;  %v5391_v12 = vld [vmem:[#allocation2 + $0x6cc] ss:$16 sps:$4 sm:$0xff]  }
  0xfa   :  { %1607 = vmatmul.mubr.bf16.vlgmr.msra.gmra.mrb[0].mxu0 %v6080_v17 }
  0xfb   :  { %4918 = vmatpush3.bf16.msra.mxu0 %v4917_v23  ;;  %v4939_v23 = vpack.c.bf16 %v1869_v22, %v1868_v21  ;;  %v312_v22 = vlaneseq }
  0xfc   :  { %1763 = vmatpush1.bf16.msra.mxu1 %v5347_v19  ;;  %4920 = vmatprep.subr.bf16.mxu0 %v4919_v26  ;;  %v5392_v19 = vld [vmem:[#allocation2 + $0x6e8] ss:$16 sps:$4 sm:$0xff]   ;;  %v4941_v26 = vpack.c.bf16 %v1853_v25, %v1852_v24  ;;  %v310_v25 = vld [vmem:[%s6301_s2] sm:$0xf] }
  0xfd   :  { %1764 = vmatprep.subr.bf16.mxu1 %v5352_v20  ;;  %v5819_v20 = vld [vmem:[%s6299_s0 + $0x18] ss:$28 sps:$4 sm:$0xff]  }
  0xff   :  { %4922 = vmatpush3.bf16.msra.mxu0 %v4921_v31  ;;  %v1855_v31 = vld [vmem:[#allocation5 + $0x78] sm:$0xff] }
 0x100   :  { %1765 = vmatpush1.bf16.msra.mxu1 %v5350_v27  ;;  %4924 = vmatprep.subr.bf16.mxu0 %v4923_v34  ;;  %v1870_v27 = vld [vmem:[#allocation5 + $0xf0] sm:$0xff]  ;;  %v4945_v32 = vpack.c.bf16 %v1855_v31, %v1854_v30  ;;  %v1889_v34 = vld [vmem:[#allocation5 + $0x188] sm:$0xff] }
 0x101   :  { %1766 = vmatprep.subr.bf16.mxu1 %v5355_v28  ;;  %v1871_v28 = vld [vmem:[#allocation5 + $0xf8] sm:$0xff] }
 0x102   :  { %v4943_v29 = vpack.c.bf16 %v1871_v28, %v1870_v27 }
 0x103   :  { %4926 = vmatpush3.bf16.msra.mxu0 %v4925_v39  ;;  %v1891_v39 = vld [vmem:[#allocation5 + $0x198] sm:$0xff] }
 0x104   :  { %1767 = vmatpush1.bf16.msra.mxu1 %v5353_v35  ;;  %4928 = vmatprep.subr.bf16.mxu0 %v4927_v42  ;;  %v1872_v35 = vld [vmem:[#allocation5 + $0x100] sm:$0xff]  ;;  %v4951_v41 = vpack.c.bf16 %v1891_v39, %v1890_v38  ;;  %v1874_v42 = vld [vmem:[#allocation5 + $0x110] sm:$0xff] }
 0x105   :  { %1768 = vmatprep.subr.bf16.mxu1 %v5358_v36  ;;  %v4947_v36 = vpack.c.bf16 %v1889_v34, %v1888_v33  ;;  %v4949_v40 = vpack.c.bf16 %v1873_v37, %v1872_v35 }
 0x107   :  { %4930 = vmatpush3.bf16.msra.mxu0 %v4929_v47 }
 0x108   :  { %1769 = vmatpush1.bf16.msra.mxu1 %v5356_v43  ;;  %4932 = vmatprep.subr.bf16.mxu0 %v4931_v50  ;;  %v1875_v43 = vld [vmem:[#allocation5 + $0x118] sm:$0xff]  ;;  %v1894_v50 = vld [vmem:[#allocation5 + $0x1b0] sm:$0xff] }
 0x109   :  { %1770 = vmatprep.subr.bf16.mxu1 %v5361_v44  ;;  %v1892_v44 = vld [vmem:[#allocation5 + $0x1a0] sm:$0xff]  ;;  %v4953_v46 = vpack.c.bf16 %v1875_v43, %v1874_v42 }
 0x10a   :  { %v4955_v47 = vpack.c.bf16 %v1893_v45, %v1892_v44 }
 0x10b   :  { %4934 = vmatpush3.bf16.msra.mxu0 %v4933_v55  ;;  %v1879_v55 = vld [vmem:[#allocation5 + $0x138] sm:$0xff] }
 0x10c   :  { %1771 = vmatpush1.bf16.msra.mxu1 %v5359_v51  ;;  %4936 = vmatprep.subr.bf16.mxu0 %v4935_v56  ;;  %v1895_v51 = vld [vmem:[#allocation5 + $0x1b8] sm:$0xff]  ;;  %v1896_v56 = vld [vmem:[#allocation5 + $0x1c0] sm:$0xff] }
 0x10d   :  { %1772 = vmatprep.subr.bf16.mxu1 %v5364_v52  ;;  %v4957_v52 = vpack.c.bf16 %v1877_v49, %v1876_v48  ;;  %v4959_v53 = vpack.c.bf16 %v1895_v51, %v1894_v50 }
 0x10f   :  { %4938 = vmatpush3.bf16.msra.mxu0 %v4937_v59 }
 0x110   :  { %1773 = vmatpush1.bf16.msra.mxu1 %v5362_v57  ;;  %4940 = vmatprep.subr.bf16.mxu0 %v4939_v23  ;;  %v1897_v57 = vld [vmem:[#allocation5 + $0x1c8] sm:$0xff]  ;;  %v6096_v23 = vshrl.u32 %v312_v22, 7 }
 0x111   :  { %1774 = vmatprep.subr.bf16.mxu1 %v5367_v58  ;;  %v4961_v58 = vpack.c.bf16 %v1879_v55, %v1878_v54  ;;  %v4963_v59 = vpack.c.bf16 %v1897_v57, %v1896_v56  ;;  %v5395_v57 = vld [vmem:[%s6304_s5] ss:$16 sps:$4 sm:$0xff]   ;;  %v5436_v22 = vld [vmem:[%s6304_s5 + $0xcc] ss:$16 sps:$4 sm:$0xff]  }
 0x112   :  { %v6099_v24 = vsub.s32 0, %v6096_v23 }
 0x113   :  { %4942 = vmatpush3.bf16.msra.mxu0 %v4941_v26  ;;  %v6105_v26 = vsub.s32 1, %v6096_v23 }
 0x114   :  { %1775 = vmatpush1.bf16.msra.mxu1 %v5365_v60  ;;  %4944 = vmatprep.subr.bf16.mxu0 %v4943_v29  ;;  %v1880_v60 = vld [vmem:[#allocation5 + $0x140] sm:$0xff]  ;;  %v315_v27 = vrot.slane %v310_v25, %v6099_v24 }
 0x115   :  { %1776 = vmatprep.subr.bf16.mxu1 %v5370_v61  ;;  %v1881_v61 = vld [vmem:[#allocation5 + $0x148] sm:$0xff]  ;;  %v319_v28 = vrot.slane %v310_v25, %v6105_v26 }
 0x117   :  { %4946 = vmatpush3.bf16.msra.mxu0 %v4945_v32 }
 0x118   :  { %1777 = vmatpush1.bf16.msra.mxu1 %v5368_v62  ;;  %v1898_v62 = vld [vmem:[#allocation5 + $0x1d0] sm:$0xff] }
 0x119   :  { %1789 = vmatprep.subr.bf16.mxu1 %v5373_v63  ;;  %v1899_v63 = vld [vmem:[#allocation5 + $0x1d8] sm:$0xff] }
 0x11b   :  { %1779 = vmatmul.mubr.bf16.vlgmr.msra.gmra.mrb[4].mxu1 %v6080_v17 }
 0x11c   :  { %1790 = vmatpush1.bf16.msra.mxu1 %v5371_v1  ;;  %1821 = vmatprep.mubr.bf16.mxu1 %v5947_v0  ;;  %v4965_v1 = vpack.c.bf16 %v1881_v61, %v1880_v60  ;;  %v5400_v60 = vld [vmem:[%s6304_s5 + $0xc] ss:$16 sps:$4 sm:$0xff]  }
 0x11d   :  { %1791 = vmatprep.subr.bf16.mxu1 %v5376_v2  ;;  %v4967_v2 = vpack.c.bf16 %v1899_v63, %v1898_v62  ;;  %v5406_v61 = vld [vmem:[%s6304_s5 + $0x2c] ss:$16 sps:$4 sm:$0xff]   ;;  %v5401_v62 = vld [vmem:[%s6304_s5 + $0x20] ss:$16 sps:$4 sm:$0xff]   ;;  %v5404_v63 = vld [vmem:[%s6304_s5 + $0x28] ss:$16 sps:$4 sm:$0xff]  }
 0x120   :  { %1792 = vmatpush1.bf16.msra.mxu1 %v5374_v3  ;;  %v1882_v3 = vld [vmem:[#allocation5 + $0x150] sm:$0xff] }
 0x121   :  { %1793 = vmatprep.subr.bf16.mxu1 %v5379_v4  ;;  %v1883_v4 = vld [vmem:[#allocation5 + $0x158] sm:$0xff] }
 0x124   :  { %1794 = vmatpush1.bf16.msra.mxu1 %v5377_v5  ;;  %v1900_v5 = vld [vmem:[#allocation5 + $0x1e0] sm:$0xff] }
 0x125   :  { %1795 = vmatprep.subr.bf16.mxu1 %v5382_v6  ;;  %v1901_v6 = vld [vmem:[#allocation5 + $0x1e8] sm:$0xff] }
 0x128   :  { %1796 = vmatpush1.bf16.msra.mxu1 %v5380_v7  ;;  %v4969_v7 = vpack.c.bf16 %v1883_v4, %v1882_v3  ;;  %v5407_v3 = vld [vmem:[%s6304_s5 + $0x40] ss:$16 sps:$4 sm:$0xff]   ;;  %v5410_v4 = vld [vmem:[%s6304_s5 + $0x48] ss:$16 sps:$4 sm:$0xff]  }
 0x129   :  { %1797 = vmatprep.subr.bf16.mxu1 %v5385_v8  ;;  %v4971_v8 = vpack.c.bf16 %v1901_v6, %v1900_v5  ;;  %v5415_v5 = vld [vmem:[%s6304_s5 + $0x64] ss:$16 sps:$4 sm:$0xff]   ;;  %v5418_v6 = vld [vmem:[%s6304_s5 + $0x6c] ss:$16 sps:$4 sm:$0xff]  }
 0x12c   :  { %1798 = vmatpush1.bf16.msra.mxu1 %v5383_v9  ;;  %v1884_v9 = vld [vmem:[#allocation5 + $0x160] sm:$0xff] }
 0x12d   :  { %1799 = vmatprep.subr.bf16.mxu1 %v5388_v10  ;;  %v1885_v10 = vld [vmem:[#allocation5 + $0x168] sm:$0xff] }
 0x12e   :  { %v6085_v13 = vpop.f32.mrb[0].mxu1 }
 0x12f   :  { %v6087_v15 = vpop.f32.mrb[1].mxu1 }
 0x130   :  { %v6089_v17 = vpop.f32.mrb[2].mxu1  ;;  %1800 = vmatpush1.bf16.msra.mxu1 %v5386_v11  ;;  %v4973_v11 = vpack.c.bf16 %v1885_v10, %v1884_v9  ;;  %v5421_v9 = vld [vmem:[%s6304_s5 + $0x84] ss:$16 sps:$4 sm:$0xff]   ;;  %v5424_v10 = vld [vmem:[%s6304_s5 + $0x8c] ss:$16 sps:$4 sm:$0xff]  }
 0x131   :  { %v6091_v18 = vpop.f32.mrb[3].mxu1  ;;  %1801 = vmatprep.subr.bf16.mxu1 %v5391_v12  ;;  %v1902_v12 = vld [vmem:[#allocation5 + $0x1f0] sm:$0xff] }
 0x134   :  { %1802 = vmatpush1.bf16.msra.mxu1 %v5389_v14  ;;  %v1903_v14 = vld [vmem:[#allocation5 + $0x1f8] sm:$0xff] }
 0x135   :  { %1803 = vmatprep.subr.bf16.mxu1 %v5394_v16  ;;  %v4975_v16 = vpack.c.bf16 %v1903_v14, %v1902_v12  ;;  %v5422_v12 = vld [vmem:[%s6304_s5 + $0x88] ss:$16 sps:$4 sm:$0xff]   ;;  %v5427_v14 = vld [vmem:[%s6304_s5 + $0xa4] ss:$16 sps:$4 sm:$0xff]  }
 0x138   :  { %1804 = vmatpush1.bf16.msra.mxu1 %v5392_v19  ;;  %v1886_v19 = vld [vmem:[#allocation5 + $0x170] sm:$0xff] }
 0x139   :  { %4948 = vmatprep.subr.bf16.mxu1 %v4947_v36 }
 0x13b   :  { %1822 = vmatmul.mubr.bf16.vlgmr.msra.gmra.mrb[4].mxu1 %v5819_v20  ;;  %v1887_v20 = vld [vmem:[#allocation5 + $0x178] sm:$0xff] }
 0x13c   :  { %4950 = vmatpush3.bf16.msra.mxu1 %v4949_v40  ;;  %v4977_v21 = vpack.c.bf16 %v1887_v20, %v1886_v19  ;;  %v5425_v19 = vld [vmem:[%s6304_s5 + $0xa0] ss:$16 sps:$4 sm:$0xff]   ;;  %v5428_v20 = vld [vmem:[%s6304_s5 + $0xa8] ss:$16 sps:$4 sm:$0xff]  }
 0x13d   :  { %4952 = vmatprep.subr.bf16.mxu1 %v4951_v41 }
 0x140   :  { %4954 = vmatpush3.bf16.msra.mxu1 %v4953_v46 }
 0x141   :  { %4956 = vmatprep.subr.bf16.mxu1 %v4955_v47 }
 0x144   :  { %4958 = vmatpush3.bf16.msra.mxu1 %v4957_v52 }
 0x145   :  { %4960 = vmatprep.subr.bf16.mxu1 %v4959_v53 }
 0x148   :  { %4962 = vmatpush3.bf16.msra.mxu1 %v4961_v58  ;;  %v5397_v58 = vld [vmem:[%s6304_s5 + $0x4] ss:$16 sps:$4 sm:$0xff]  }
 0x149   :  { %4964 = vmatprep.subr.bf16.mxu1 %v4963_v59  ;;  %v5398_v59 = vld [vmem:[%s6304_s5 + $0x8] ss:$16 sps:$4 sm:$0xff]   ;;  %2276 = vmatprep.subr.bf16.mxu0 %v5397_v58  ;;  %v5455_v58 = vld [vmem:[#allocation7 + $0x70] ss:$28 sps:$4 sm:$0xff]  }
 0x14c   :  { %4966 = vmatpush3.bf16.msra.mxu1 %v4965_v1  ;;  %v5409_v1 = vld [vmem:[%s6304_s5 + $0x44] ss:$16 sps:$4 sm:$0xff]  }
 0x14d   :  { %4968 = vmatprep.subr.bf16.mxu1 %v4967_v2  ;;  %v5412_v2 = vld [vmem:[%s6304_s5 + $0x4c] ss:$16 sps:$4 sm:$0xff]  }
 0x150   :  { %4970 = vmatpush3.bf16.msra.mxu1 %v4969_v7  ;;  %v5413_v7 = vld [vmem:[%s6304_s5 + $0x60] ss:$16 sps:$4 sm:$0xff]  }
 0x151   :  { %4972 = vmatprep.subr.bf16.mxu1 %v4971_v8  ;;  %v5416_v8 = vld [vmem:[%s6304_s5 + $0x68] ss:$16 sps:$4 sm:$0xff]  }
 0x154   :  { %4974 = vmatpush3.bf16.msra.mxu1 %v4973_v11  ;;  %v5419_v11 = vld [vmem:[%s6304_s5 + $0x80] ss:$16 sps:$4 sm:$0xff]  }
 0x155   :  { %4976 = vmatprep.subr.bf16.mxu1 %v4975_v16  ;;  %v5430_v16 = vld [vmem:[%s6304_s5 + $0xac] ss:$16 sps:$4 sm:$0xff]  }
 0x158   :  { %4978 = vmatpush3.bf16.msra.mxu1 %v4977_v21  ;;  %v5433_v21 = vld [vmem:[%s6304_s5 + $0xc4] ss:$16 sps:$4 sm:$0xff]  }
 0x159   :  { %2319 = vmatprep.subr.bf16.mxu1 %v5400_v60  ;;  %v5463_v60 = vld [vmem:[#allocation7 + $0xac] ss:$28 sps:$4 sm:$0xff]  }
 0x1cd   :  { %v1608_v29 = vpop.f32.mrb[0].mxu0 }
 0x1ce   :  { %v4979_v30 = vadd.f32 %v1608_v29, %v315_v27  ;;  %v1610_v31 = vpop.f32.mrb[1].mxu0  ;;  %v5442_v29 = vld [vmem:[%s6304_s5 + $0xec] ss:$16 sps:$4 sm:$0xff]  }
 0x1cf   :  { %v4981_v32 = vadd.f32 %v1610_v31, %v319_v28  ;;  %v1612_v33 = vpop.f32.mrb[2].mxu0  ;;  %v5440_v31 = vld [vmem:[%s6304_s5 + $0xe8] ss:$16 sps:$4 sm:$0xff]  }
 0x1d0   :  { %v4980_v34 = vadd.f32 %v4979_v30, %v6085_v13  ;;  %v4983_v35 = vadd.f32 %v1612_v33, %v315_v27  ;;  %v1614_v36 = vpop.f32.mrb[3].mxu0  ;;  %v6115_v13 = vsub.s32 2, %v6096_v23  ;;  %v5434_v27 = vld [vmem:[%s6304_s5 + $0xc8] ss:$16 sps:$4 sm:$0xff]   ;;  %v5437_v30 = vld [vmem:[%s6304_s5 + $0xe0] ss:$16 sps:$4 sm:$0xff]  }
 0x1d1   :  { %v4982_v37 = vadd.f32 %v4981_v32, %v6087_v15  ;;  %v4985_v38 = vadd.f32 %v1614_v36, %v319_v28  ;;  %v6118_v15 = vsub.s32 3, %v6096_v23  ;;  %v5439_v28 = vld [vmem:[%s6304_s5 + $0xe4] ss:$16 sps:$4 sm:$0xff]   ;;  %v5448_v33 = vld [vmem:[#allocation7 + $0xc] ss:$28 sps:$4 sm:$0xff]  }
 0x1d2   :  { %v4984_v39 = vadd.f32 %v4983_v35, %v6089_v17  ;;  %v1832_v42 = vmax.f32 %v4980_v34, 0.0  ;;  %v323_v17 = vrot.slane %v310_v25, %v6115_v13  ;;  %v5445_v32 = vld [vmem:[#allocation7 + $0x4] ss:$28 sps:$4 sm:$0xff]  }
 0x1d3   :  { %v1833_v40 = vmax.f32 %v4982_v37, 0.0  ;;  %v4986_v41 = vadd.f32 %v4985_v38, %v6091_v18  ;;  %v327_v45 = vrot.slane %v310_v25, %v6118_v15  ;;  %v5431_v25 = vld [vmem:[%s6304_s5 + $0xc0] ss:$16 sps:$4 sm:$0xff]  }
 0x1d4   :  { %v1836_v44 = vmax.f32 %v4984_v39, 0.0 }
 0x1d5   :  { %v1837_v43 = vmax.f32 %v4986_v41, 0.0  ;;  %1975 = vmatprep.mubr.f32.mxu0 %v1833_v40  ;;  %v4524_v40 = vld [vmem:[%s6303_s4] ss:$0 sm:$0xff] }
 0x1d6   :  { %1976 = vmatmul.mubr.f32.vlgmr.msra.gmra.mrb[4].mxu0 %v1832_v42 }
 0x1d7   :  { %1980 = vmatprep.mubr.f32.mxu0 %v1837_v43  ;;  %2277 = vmatpush1.bf16.msra.mxu0 %v5395_v57  ;;  %v5460_v57 = vld [vmem:[#allocation7 + $0x7c] ss:$28 sps:$4 sm:$0xff]  }
 0x1da   :  { %1981 = vmatmul.mubr.f32.gmra.mrb[6].mxu0 %v1836_v44 }
 0x1db   :  { %2308 = vmatprep.mubr.bf16.mxu0 %v5947_v0 }
 0x20e   :  { %v1823_v18 = vpop.f32.mrb[4].mxu1 }
 0x20f   :  { %v4987_v46 = vadd.f32 %v1823_v18, %v323_v17  ;;  %v1825_v47 = vpop.f32.mrb[5].mxu1 }
 0x210   :  { %v4988_v48 = vadd.f32 %v1825_v47, %v327_v45  ;;  %v1827_v49 = vpop.f32.mrb[6].mxu1 }
 0x211   :  { %v1829_v50 = vpop.f32.mrb[7].mxu1  ;;  %v1834_v53 = vmax.f32 %v4987_v46, 0.0  ;;  %v4989_v54 = vadd.f32 %v1827_v49, %v323_v17  ;;  %v5443_v49 = vld [vmem:[#allocation7] ss:$28 sps:$4 sm:$0xff]  }
 0x212   :  { %v1835_v51 = vmax.f32 %v4988_v48, 0.0  ;;  %v4990_v52 = vadd.f32 %v1829_v50, %v327_v45  ;;  %v5446_v50 = vld [vmem:[#allocation7 + $0x8] ss:$28 sps:$4 sm:$0xff]  }
 0x213   :  { %v1838_v56 = vmax.f32 %v4989_v54, 0.0  ;;  %v5449_v54 = vld [vmem:[#allocation7 + $0x38] ss:$28 sps:$4 sm:$0xff]  }
 0x214   :  { %v1839_v55 = vmax.f32 %v4990_v52, 0.0  ;;  %2050 = vmatprep.mubr.f32.mxu1 %v1835_v51  ;;  %v5451_v52 = vld [vmem:[#allocation7 + $0x3c] ss:$28 sps:$4 sm:$0xff]  }
 0x215   :  { %2051 = vmatmul.mubr.f32.vlgmr.msra.gmra.mrb[8].mxu1 %v1834_v53  ;;  %v5454_v53 = vld [vmem:[#allocation7 + $0x44] ss:$28 sps:$4 sm:$0xff]  }
 0x216   :  { %2055 = vmatprep.mubr.f32.mxu1 %v1839_v55  ;;  %2320 = vmatpush1.bf16.msra.mxu1 %v5398_v59  ;;  %v5452_v55 = vld [vmem:[#allocation7 + $0x40] ss:$28 sps:$4 sm:$0xff]   ;;  %v5458_v59 = vld [vmem:[#allocation7 + $0x78] ss:$28 sps:$4 sm:$0xff]  }
 0x217   :  { %2321 = vmatprep.subr.bf16.mxu1 %v5406_v61  ;;  %v5461_v61 = vld [vmem:[#allocation7 + $0xa8] ss:$28 sps:$4 sm:$0xff]  }
 0x219   :  { %2056 = vmatmul.mubr.f32.gmra.mrb[10].mxu1 %v1838_v56  ;;  %v5457_v56 = vld [vmem:[#allocation7 + $0x74] ss:$28 sps:$4 sm:$0xff]  }
 0x21a   :  { %2351 = vmatprep.mubr.bf16.mxu1 %v5947_v0  ;;  %v5403_v0 = vld [vmem:[%s6304_s5 + $0x24] ss:$16 sps:$4 sm:$0xff]   ;;  %2322 = vmatpush1.bf16.msra.mxu1 %v5404_v63 }
 0x21b   :  { %2278 = vmatprep.subr.bf16.mxu0 %v5403_v0  ;;  %2323 = vmatprep.subr.bf16.mxu1 %v5412_v2  ;;  %v5466_v0 = vld [vmem:[#allocation7 + $0xb4] ss:$28 sps:$4 sm:$0xff]   ;;  %v5469_v63 = vld [vmem:[#allocation7 + $0xe4] ss:$28 sps:$4 sm:$0xff]  }
 0x21c   :  { %2279 = vmatpush1.bf16.msra.mxu0 %v5401_v62  ;;  %v5464_v62 = vld [vmem:[#allocation7 + $0xb0] ss:$28 sps:$4 sm:$0xff]   ;;  %v5467_v2 = vld [vmem:[#allocation7 + $0xe0] ss:$28 sps:$4 sm:$0xff]  }
 0x21d   :  { %2280 = vmatprep.subr.bf16.mxu0 %v5409_v1  ;;  %v5472_v1 = vld [vmem:[#allocation7 + $0xec] ss:$28 sps:$4 sm:$0xff]  }
 0x21e   :  { %2324 = vmatpush1.bf16.msra.mxu1 %v5410_v4  ;;  %v5475_v4 = vld [vmem:[#allocation7 + $0x11c] ss:$28 sps:$4 sm:$0xff]  }
 0x21f   :  { %2325 = vmatprep.subr.bf16.mxu1 %v5418_v6  ;;  %v5473_v6 = vld [vmem:[#allocation7 + $0x118] ss:$28 sps:$4 sm:$0xff]  }
 0x220   :  { %2281 = vmatpush1.bf16.msra.mxu0 %v5407_v3  ;;  %v5470_v3 = vld [vmem:[#allocation7 + $0xe8] ss:$28 sps:$4 sm:$0xff]  }
 0x221   :  { %2282 = vmatprep.subr.bf16.mxu0 %v5415_v5  ;;  %v5478_v5 = vld [vmem:[#allocation7 + $0x124] ss:$28 sps:$4 sm:$0xff]  }
 0x222   :  { %2326 = vmatpush1.bf16.msra.mxu1 %v5416_v8  ;;  %v5481_v8 = vld [vmem:[#allocation7 + $0x154] ss:$28 sps:$4 sm:$0xff]  }
 0x223   :  { %2327 = vmatprep.subr.bf16.mxu1 %v5424_v10  ;;  %v5479_v10 = vld [vmem:[#allocation7 + $0x150] ss:$28 sps:$4 sm:$0xff]  }
 0x224   :  { %2283 = vmatpush1.bf16.msra.mxu0 %v5413_v7  ;;  %v5476_v7 = vld [vmem:[#allocation7 + $0x120] ss:$28 sps:$4 sm:$0xff]  }
 0x225   :  { %2284 = vmatprep.subr.bf16.mxu0 %v5421_v9  ;;  %v5484_v9 = vld [vmem:[#allocation7 + $0x15c] ss:$28 sps:$4 sm:$0xff]  }
 0x226   :  { %2328 = vmatpush1.bf16.msra.mxu1 %v5422_v12  ;;  %v5487_v12 = vld [vmem:[#allocation7 + $0x18c] ss:$28 sps:$4 sm:$0xff]  }
 0x227   :  { %2329 = vmatprep.subr.bf16.mxu1 %v5430_v16  ;;  %v5485_v16 = vld [vmem:[#allocation7 + $0x188] ss:$28 sps:$4 sm:$0xff]  }
 0x228   :  { %2285 = vmatpush1.bf16.msra.mxu0 %v5419_v11  ;;  %v5482_v11 = vld [vmem:[#allocation7 + $0x158] ss:$28 sps:$4 sm:$0xff]  }
 0x229   :  { %2286 = vmatprep.subr.bf16.mxu0 %v5427_v14  ;;  %v5490_v14 = vld [vmem:[#allocation7 + $0x194] ss:$28 sps:$4 sm:$0xff]  }
 0x22a   :  { %2330 = vmatpush1.bf16.msra.mxu1 %v5428_v20  ;;  %v5493_v20 = vld [vmem:[#allocation7 + $0x1c4] ss:$28 sps:$4 sm:$0xff]  }
 0x22b   :  { %2331 = vmatprep.subr.bf16.mxu1 %v5436_v22  ;;  %v5491_v22 = vld [vmem:[#allocation7 + $0x1c0] ss:$28 sps:$4 sm:$0xff]  }
 0x22c   :  { %2287 = vmatpush1.bf16.msra.mxu0 %v5425_v19  ;;  %v5488_v19 = vld [vmem:[#allocation7 + $0x190] ss:$28 sps:$4 sm:$0xff]  }
 0x22d   :  { %2288 = vmatprep.subr.bf16.mxu0 %v5433_v21  ;;  %v5496_v21 = vld [vmem:[#allocation7 + $0x1cc] ss:$28 sps:$4 sm:$0xff]  }
 0x22e   :  { %2332 = vmatpush1.bf16.msra.mxu1 %v5434_v27  ;;  %v5499_v27 = vld [vmem:[#allocation7 + $0x1fc] ss:$28 sps:$4 sm:$0xff]  }
 0x22f   :  { %2333 = vmatprep.subr.bf16.mxu1 %v5442_v29  ;;  %v5497_v29 = vld [vmem:[#allocation7 + $0x1f8] ss:$28 sps:$4 sm:$0xff]  }
 0x230   :  { %2289 = vmatpush1.bf16.msra.mxu0 %v5431_v25  ;;  %v5494_v25 = vld [vmem:[#allocation7 + $0x1c8] ss:$28 sps:$4 sm:$0xff]  }
 0x231   :  { %2290 = vmatprep.subr.bf16.mxu0 %v5439_v28  ;;  %v5502_v28 = vld [vmem:[#allocation7 + $0x204] ss:$28 sps:$4 sm:$0xff]  }
 0x232   :  { %2334 = vmatpush1.bf16.msra.mxu1 %v5440_v31  ;;  %v5505_v31 = vld [vmem:[#allocation7 + $0x234] ss:$28 sps:$4 sm:$0xff]  }
 0x233   :  { %3905 = vmatprep.subr.bf16.mxu1 %v5448_v33  ;;  %v5503_v33 = vld [vmem:[#allocation7 + $0x230] ss:$28 sps:$4 sm:$0xff]  }
 0x234   :  { %2291 = vmatpush1.bf16.msra.mxu0 %v5437_v30  ;;  %v5500_v30 = vld [vmem:[#allocation7 + $0x200] ss:$28 sps:$4 sm:$0xff]  }
 0x235   :  { %3819 = vmatprep.subr.bf16.mxu0 %v5445_v32  ;;  %v5508_v32 = vld [vmem:[#allocation7 + $0x23c] ss:$28 sps:$4 sm:$0xff]  }
 0x2a9   :  { %v4827_v34 = vpop.f32.mrb[4].mxu0 }
 0x2aa   :  { %v4828_v35 = vpop.f32.mrb[5].mxu0 }
 0x2ab   :  { %v4829_v36 = vadd.f32 %v4828_v35, %v4827_v34  ;;  %v5506_v34 = vld [vmem:[#allocation7 + $0x238] ss:$28 sps:$4 sm:$0xff]   ;;  %v5511_v35 = vld [vmem:[#allocation7 + $0x26c] ss:$28 sps:$4 sm:$0xff]  }
 0x2ad   :  { %v4830_v37 = vpop.f32.mrb[6].mxu0  ;;  %v1978_v43 = vadd.f32 %v4829_v36, %v4524_v40  ;;  %v5514_v36 = vld [vmem:[#allocation7 + $0x274] ss:$28 sps:$4 sm:$0xff]  }
 0x2ae   :  { %v4831_v38 = vpop.f32.mrb[7].mxu0 }
 0x2af   :  { %v4832_v39 = vadd.f32 %v4831_v38, %v4830_v37  ;;  %v5509_v37 = vld [vmem:[#allocation7 + $0x268] ss:$28 sps:$4 sm:$0xff]   ;;  %v5512_v38 = vld [vmem:[#allocation7 + $0x270] ss:$28 sps:$4 sm:$0xff]  }
 0x2b1   :  { %v1983_v46 = vadd.f32 %v4832_v39, %v4524_v40  ;;  %v5517_v39 = vld [vmem:[#allocation7 + $0x2a4] ss:$28 sps:$4 sm:$0xff]   ;;  %v5520_v40 = vld [vmem:[#allocation7 + $0x2ac] ss:$28 sps:$4 sm:$0xff]  }
 0x2e8   :  { %v4865_v41 = vpop.f32.mrb[8].mxu1 }
 0x2e9   :  { %v4866_v42 = vpop.f32.mrb[9].mxu1 }
 0x2ea   :  { %v4867_v44 = vadd.f32 %v4866_v42, %v4865_v41  ;;  %v5515_v41 = vld [vmem:[#allocation7 + $0x2a0] ss:$28 sps:$4 sm:$0xff]   ;;  %v5518_v42 = vld [vmem:[#allocation7 + $0x2a8] ss:$28 sps:$4 sm:$0xff]  }
 0x2ec   :  { %v2053_v17 = vadd.f32 %v4867_v44, %v1978_v43  ;;  %v4868_v45 = vpop.f32.mrb[10].mxu1  ;;  %v5523_v43 = vld [vmem:[#allocation7 + $0x2dc] ss:$28 sps:$4 sm:$0xff]   ;;  %v5526_v44 = vld [vmem:[#allocation7 + $0x2e4] ss:$28 sps:$4 sm:$0xff]  }
 0x2ed   :  { %v4869_v18 = vpop.f32.mrb[11].mxu1 }
 0x2ee   :  { %4257 = vst [vmem:[#allocation9] sm:$0xff] %v2053_v17  ;;  %v4870_v47 = vadd.f32 %v4869_v18, %v4868_v45  ;;  %v5524_v45 = vld [vmem:[#allocation7 + $0x2e0] ss:$28 sps:$4 sm:$0xff]   ;;  %v5529_v18 = vld [vmem:[#allocation7 + $0x314] ss:$28 sps:$4 sm:$0xff]  }
 0x2f0   :  { %v2058_v48 = vadd.f32 %v4870_v47, %v1983_v46  ;;  %v5532_v46 = vld [vmem:[#allocation7 + $0x31c] ss:$28 sps:$4 sm:$0xff]   ;;  %v5527_v47 = vld [vmem:[#allocation7 + $0x310] ss:$28 sps:$4 sm:$0xff]  }
 0x2f2   :  { %v2061_v51 = vpack.c.bf16 %v2058_v48, %v2053_v17  ;;  %4258 = vst [vmem:[#allocation9 + $0x8] sm:$0xff] %v2058_v48  ;;  %v5521_v17 = vld [vmem:[#allocation7 + $0x2d8] ss:$28 sps:$4 sm:$0xff]  }
 0x2f3   :  { %v5530_v48 = vld [vmem:[#allocation7 + $0x318] ss:$28 sps:$4 sm:$0xff]  }
 0x2f4   :  { %2309 = vmatmul.mubr.bf16.vlgmr.msra.gmra.mrb[8].mxu0 %v2061_v51  ;;  %2352 = vmatmul.mubr.bf16.vlgmr.msra.gmra.mrb[12].mxu1 %v2061_v51  ;;  %v5533_v51 = vld [vmem:[#allocation7 + $0x348] ss:$28 sps:$4 sm:$0xff]  }
 0x2f5   :  { %3820 = vmatpush1.bf16.msra.mxu0 %v5443_v49  ;;  %3906 = vmatpush1.bf16.msra.mxu1 %v5446_v50  ;;  %v5535_v49 = vld [vmem:[#allocation7 + $0x34c] ss:$28 sps:$4 sm:$0xff]   ;;  %v5538_v50 = vld [vmem:[#allocation7 + $0x354] ss:$28 sps:$4 sm:$0xff]  }
 0x2f6   :  { %3821 = vmatprep.subr.bf16.mxu0 %v5451_v52  ;;  %3907 = vmatprep.subr.bf16.mxu1 %v5454_v53  ;;  %v5536_v52 = vld [vmem:[#allocation7 + $0x350] ss:$28 sps:$4 sm:$0xff]   ;;  %v5541_v53 = vld [vmem:[#allocation7 + $0x384] ss:$28 sps:$4 sm:$0xff]  }
 0x2f9   :  { %3822 = vmatpush1.bf16.msra.mxu0 %v5449_v54  ;;  %3908 = vmatpush1.bf16.msra.mxu1 %v5452_v55  ;;  %v5544_v54 = vld [vmem:[#allocation7 + $0x38c] ss:$28 sps:$4 sm:$0xff]   ;;  %v2094_v55 = vld [vmem:[%s6305_s6] sm:$0xf] }
 0x2fa   :  { %3823 = vmatprep.subr.bf16.mxu0 %v5457_v56  ;;  %3909 = vmatprep.subr.bf16.mxu1 %v5460_v57  ;;  %v2099_v56 = vrot.slane %v2094_v55, %v6099_v24  ;;  %v2107_v57 = vrot.slane %v2094_v55, %v6115_v13 }
 0x2fd   :  { %3824 = vmatpush1.bf16.msra.mxu0 %v5455_v58  ;;  %3910 = vmatpush1.bf16.msra.mxu1 %v5458_v59  ;;  %v2103_v58 = vrot.slane %v2094_v55, %v6105_v26  ;;  %v2111_v59 = vrot.slane %v2094_v55, %v6118_v15  ;;  %v5583_v55 = vld [vmem:[#allocation7 + $0x50c] ss:$28 sps:$4 sm:$0xff]  }
 0x2fe   :  { %3825 = vmatprep.subr.bf16.mxu0 %v5463_v60  ;;  %3911 = vmatprep.subr.bf16.mxu1 %v5466_v0 }
 0x301   :  { %3826 = vmatpush1.bf16.msra.mxu0 %v5461_v61  ;;  %3912 = vmatpush1.bf16.msra.mxu1 %v5464_v62 }
 0x302   :  { %3827 = vmatprep.subr.bf16.mxu0 %v5469_v63  ;;  %3913 = vmatprep.subr.bf16.mxu1 %v5472_v1 }
 0x305   :  { %3828 = vmatpush1.bf16.msra.mxu0 %v5467_v2  ;;  %3914 = vmatpush1.bf16.msra.mxu1 %v5470_v3 }
 0x306   :  { %3829 = vmatprep.subr.bf16.mxu0 %v5475_v4  ;;  %3915 = vmatprep.subr.bf16.mxu1 %v5478_v5 }
 0x309   :  { %3830 = vmatpush1.bf16.msra.mxu0 %v5473_v6  ;;  %3916 = vmatpush1.bf16.msra.mxu1 %v5476_v7 }
 0x30a   :  { %3831 = vmatprep.subr.bf16.mxu0 %v5481_v8  ;;  %3917 = vmatprep.subr.bf16.mxu1 %v5484_v9 }
 0x30d   :  { %3832 = vmatpush1.bf16.msra.mxu0 %v5479_v10  ;;  %3918 = vmatpush1.bf16.msra.mxu1 %v5482_v11 }
 0x30e   :  { %3833 = vmatprep.subr.bf16.mxu0 %v5487_v12  ;;  %3919 = vmatprep.subr.bf16.mxu1 %v5490_v14 }
 0x311   :  { %3834 = vmatpush1.bf16.msra.mxu0 %v5485_v16  ;;  %3920 = vmatpush1.bf16.msra.mxu1 %v5488_v19 }
 0x312   :  { %3835 = vmatprep.subr.bf16.mxu0 %v5493_v20  ;;  %3921 = vmatprep.subr.bf16.mxu1 %v5496_v21 }
 0x315   :  { %3836 = vmatpush1.bf16.msra.mxu0 %v5491_v22  ;;  %3922 = vmatpush1.bf16.msra.mxu1 %v5494_v25 }
 0x316   :  { %3837 = vmatprep.subr.bf16.mxu0 %v5499_v27  ;;  %3923 = vmatprep.subr.bf16.mxu1 %v5502_v28 }
 0x319   :  { %3838 = vmatpush1.bf16.msra.mxu0 %v5497_v29  ;;  %3924 = vmatpush1.bf16.msra.mxu1 %v5500_v30 }
 0x31a   :  { %3839 = vmatprep.subr.bf16.mxu0 %v5505_v31  ;;  %3925 = vmatprep.subr.bf16.mxu1 %v5508_v32  ;;  %v5539_v31 = vld [vmem:[#allocation7 + $0x380] ss:$28 sps:$4 sm:$0xff]   ;;  %v5542_v32 = vld [vmem:[#allocation7 + $0x388] ss:$28 sps:$4 sm:$0xff]  }
 0x31d   :  { %3840 = vmatpush1.bf16.msra.mxu0 %v5503_v33  ;;  %3926 = vmatpush1.bf16.msra.mxu1 %v5506_v34  ;;  %v5547_v33 = vld [vmem:[#allocation7 + $0x3bc] ss:$28 sps:$4 sm:$0xff]   ;;  %v5550_v34 = vld [vmem:[#allocation7 + $0x3c4] ss:$28 sps:$4 sm:$0xff]  }
 0x31e   :  { %3841 = vmatprep.subr.bf16.mxu0 %v5511_v35  ;;  %3927 = vmatprep.subr.bf16.mxu1 %v5514_v36  ;;  %v5545_v35 = vld [vmem:[#allocation7 + $0x3b8] ss:$28 sps:$4 sm:$0xff]   ;;  %v5548_v36 = vld [vmem:[#allocation7 + $0x3c0] ss:$28 sps:$4 sm:$0xff]  }
 0x321   :  { %3842 = vmatpush1.bf16.msra.mxu0 %v5509_v37  ;;  %3928 = vmatpush1.bf16.msra.mxu1 %v5512_v38  ;;  %v5553_v37 = vld [vmem:[#allocation7 + $0x3f4] ss:$28 sps:$4 sm:$0xff]   ;;  %v5556_v38 = vld [vmem:[#allocation7 + $0x3fc] ss:$28 sps:$4 sm:$0xff]  }
 0x322   :  { %3843 = vmatprep.subr.bf16.mxu0 %v5517_v39  ;;  %3929 = vmatprep.subr.bf16.mxu1 %v5520_v40  ;;  %v5551_v39 = vld [vmem:[#allocation7 + $0x3f0] ss:$28 sps:$4 sm:$0xff]   ;;  %v5554_v40 = vld [vmem:[#allocation7 + $0x3f8] ss:$28 sps:$4 sm:$0xff]  }
 0x325   :  { %3844 = vmatpush1.bf16.msra.mxu0 %v5515_v41  ;;  %3930 = vmatpush1.bf16.msra.mxu1 %v5518_v42  ;;  %v5559_v41 = vld [vmem:[#allocation7 + $0x42c] ss:$28 sps:$4 sm:$0xff]   ;;  %v5562_v42 = vld [vmem:[#allocation7 + $0x434] ss:$28 sps:$4 sm:$0xff]  }
 0x326   :  { %3845 = vmatprep.subr.bf16.mxu0 %v5523_v43  ;;  %3931 = vmatprep.subr.bf16.mxu1 %v5526_v44  ;;  %v5557_v43 = vld [vmem:[#allocation7 + $0x428] ss:$28 sps:$4 sm:$0xff]   ;;  %v5560_v44 = vld [vmem:[#allocation7 + $0x430] ss:$28 sps:$4 sm:$0xff]  }
 0x329   :  { %3846 = vmatpush1.bf16.msra.mxu0 %v5521_v17  ;;  %3932 = vmatpush1.bf16.msra.mxu1 %v5524_v45  ;;  %v5565_v17 = vld [vmem:[#allocation7 + $0x464] ss:$28 sps:$4 sm:$0xff]   ;;  %v5568_v45 = vld [vmem:[#allocation7 + $0x46c] ss:$28 sps:$4 sm:$0xff]  }
 0x32a   :  { %3847 = vmatprep.subr.bf16.mxu0 %v5529_v18  ;;  %3933 = vmatprep.subr.bf16.mxu1 %v5532_v46  ;;  %v5563_v18 = vld [vmem:[#allocation7 + $0x460] ss:$28 sps:$4 sm:$0xff]   ;;  %v5566_v46 = vld [vmem:[#allocation7 + $0x468] ss:$28 sps:$4 sm:$0xff]  }
 0x32d   :  { %3848 = vmatpush1.bf16.msra.mxu0 %v5527_v47  ;;  %3934 = vmatpush1.bf16.msra.mxu1 %v5530_v48  ;;  %v5571_v47 = vld [vmem:[#allocation7 + $0x49c] ss:$28 sps:$4 sm:$0xff]   ;;  %v5574_v48 = vld [vmem:[#allocation7 + $0x4a4] ss:$28 sps:$4 sm:$0xff]  }
 0x32e   :  { %3849 = vmatprep.subr.bf16.mxu0 %v5535_v49  ;;  %3935 = vmatprep.subr.bf16.mxu1 %v5538_v50  ;;  %v5569_v49 = vld [vmem:[#allocation7 + $0x498] ss:$28 sps:$4 sm:$0xff]   ;;  %v5572_v50 = vld [vmem:[#allocation7 + $0x4a0] ss:$28 sps:$4 sm:$0xff]  }
 0x331   :  { %3850 = vmatpush1.bf16.msra.mxu0 %v5533_v51  ;;  %3936 = vmatpush1.bf16.msra.mxu1 %v5536_v52  ;;  %v5577_v51 = vld [vmem:[#allocation7 + $0x4d4] ss:$28 sps:$4 sm:$0xff]   ;;  %v5580_v52 = vld [vmem:[#allocation7 + $0x4dc] ss:$28 sps:$4 sm:$0xff]  }
 0x332   :  { %3862 = vmatprep.subr.bf16.mxu0 %v5541_v53  ;;  %3948 = vmatprep.subr.bf16.mxu1 %v5544_v54  ;;  %v5575_v53 = vld [vmem:[#allocation7 + $0x4d0] ss:$28 sps:$4 sm:$0xff]   ;;  %v5578_v54 = vld [vmem:[#allocation7 + $0x4d8] ss:$28 sps:$4 sm:$0xff]  }
 0x3c7   :  { %v2310_v60 = vpop.f32.mrb[8].mxu0  ;;  %v2353_v0 = vpop.f32.mrb[12].mxu1 }
 0x3c8   :  { %v2311_v61 = vadd.f32 %v2310_v60, %v2099_v56  ;;  %v2354_v62 = vadd.f32 %v2353_v0, %v2107_v57  ;;  %v2312_v63 = vpop.f32.mrb[9].mxu0  ;;  %v2355_v1 = vpop.f32.mrb[13].mxu1  ;;  %v5592_v60 = vld [vmem:[#allocation7 + $0x54c] ss:$28 sps:$4 sm:$0xff]   ;;  %v5587_v0 = vld [vmem:[#allocation7 + $0x540] ss:$28 sps:$4 sm:$0xff]  }
 0x3c9   :  { %v2313_v2 = vadd.f32 %v2312_v63, %v2103_v58  ;;  %v2356_v3 = vadd.f32 %v2355_v1, %v2111_v59  ;;  %v2314_v4 = vpop.f32.mrb[10].mxu0  ;;  %v2357_v5 = vpop.f32.mrb[14].mxu1  ;;  %v5598_v63 = vld [vmem:[#allocation7 + $0x584] ss:$28 sps:$4 sm:$0xff]   ;;  %v5593_v1 = vld [vmem:[#allocation7 + $0x578] ss:$28 sps:$4 sm:$0xff]  }
 0x3ca   :  { %v2315_v6 = vadd.f32 %v2314_v4, %v2099_v56  ;;  %v2358_v7 = vadd.f32 %v2357_v5, %v2107_v57  ;;  %v2316_v8 = vpop.f32.mrb[11].mxu0  ;;  %v2359_v9 = vpop.f32.mrb[15].mxu1  ;;  %v2362_v12 = vmax.f32 %v2311_v61, 0.0  ;;  %v2364_v14 = vmax.f32 %v2354_v62, 0.0  ;;  %v5586_v56 = vld [vmem:[#allocation7 + $0x514] ss:$28 sps:$4 sm:$0xff]  }
 0x3cb   :  { %v2317_v10 = vadd.f32 %v2316_v8, %v2103_v58  ;;  %v2360_v11 = vadd.f32 %v2359_v9, %v2111_v59  ;;  %v2363_v20 = vmax.f32 %v2313_v2, 0.0  ;;  %v2365_v21 = vmax.f32 %v2356_v3, 0.0  ;;  %v5581_v57 = vld [vmem:[#allocation7 + $0x508] ss:$28 sps:$4 sm:$0xff]   ;;  %v5584_v58 = vld [vmem:[#allocation7 + $0x510] ss:$28 sps:$4 sm:$0xff]  }
 0x3cc   :  { %v2366_v16 = vmax.f32 %v2315_v6, 0.0  ;;  %v2368_v19 = vmax.f32 %v2358_v7, 0.0  ;;  %v5589_v59 = vld [vmem:[#allocation7 + $0x544] ss:$28 sps:$4 sm:$0xff]   ;;  %v5595_v62 = vld [vmem:[#allocation7 + $0x57c] ss:$28 sps:$4 sm:$0xff]  }
 0x3cd   :  { %v2367_v22 = vmax.f32 %v2317_v10, 0.0  ;;  %v2369_v25 = vmax.f32 %v2360_v11, 0.0  ;;  %v5590_v61 = vld [vmem:[#allocation7 + $0x548] ss:$28 sps:$4 sm:$0xff]   ;;  %v5596_v2 = vld [vmem:[#allocation7 + $0x580] ss:$28 sps:$4 sm:$0xff]  }
 0x3ce   :  { %v6229_v27 = vpack.c.bf16 %v2366_v16, %v2362_v12  ;;  %v6231_v28 = vpack.c.bf16 %v2368_v19, %v2364_v14  ;;  %v5601_v3 = vld [vmem:[#allocation7 + $0x5b4] ss:$28 sps:$4 sm:$0xff]   ;;  %v5604_v4 = vld [vmem:[#allocation7 + $0x5bc] ss:$28 sps:$4 sm:$0xff]   ;;  %v5607_v7 = vld [vmem:[#allocation7 + $0x5ec] ss:$28 sps:$4 sm:$0xff]  }
 0x3cf   :  { %v6233_v29 = vpack.c.bf16 %v2367_v22, %v2363_v20  ;;  %v6235_v30 = vpack.c.bf16 %v2369_v25, %v2365_v21  ;;  %v5599_v5 = vld [vmem:[#allocation7 + $0x5b0] ss:$28 sps:$4 sm:$0xff]   ;;  %v5602_v6 = vld [vmem:[#allocation7 + $0x5b8] ss:$28 sps:$4 sm:$0xff]   ;;  %v5605_v9 = vld [vmem:[#allocation7 + $0x5e8] ss:$28 sps:$4 sm:$0xff]  }
 0x3d0   :  { %v5610_v8 = vld [vmem:[#allocation7 + $0x5f4] ss:$28 sps:$4 sm:$0xff]   ;;  %v5613_v11 = vld [vmem:[#allocation7 + $0x624] ss:$28 sps:$4 sm:$0xff]   ;;  %v5616_v12 = vld [vmem:[#allocation7 + $0x62c] ss:$28 sps:$4 sm:$0xff]  }
 0x3d1   :  { %3851 = vmatprep.mubr.bf16.mxu0 %v6233_v29  ;;  %3937 = vmatprep.mubr.bf16.mxu1 %v6233_v29  ;;  %v5608_v10 = vld [vmem:[#allocation7 + $0x5f0] ss:$28 sps:$4 sm:$0xff]   ;;  %v5611_v14 = vld [vmem:[#allocation7 + $0x620] ss:$28 sps:$4 sm:$0xff]   ;;  %v5614_v16 = vld [vmem:[#allocation7 + $0x628] ss:$28 sps:$4 sm:$0xff]  }
 0x3d2   :  { %3852 = vmatmul.mubr.bf16.vlgmr.msra.gmra.mrb[12].mxu0 %v6229_v27  ;;  %3938 = vmatmul.mubr.bf16.vlgmr.msra.gmra.mrb[16].mxu1 %v6229_v27  ;;  %v5619_v19 = vld [vmem:[#allocation7 + $0x65c] ss:$28 sps:$4 sm:$0xff]   ;;  %v5622_v20 = vld [vmem:[#allocation7 + $0x664] ss:$28 sps:$4 sm:$0xff]   ;;  %v5625_v25 = vld [vmem:[#allocation7 + $0x694] ss:$28 sps:$4 sm:$0xff]  }
 0x3d3   :  { %3863 = vmatpush1.bf16.msra.mxu0 %v5539_v31  ;;  %3949 = vmatpush1.bf16.msra.mxu1 %v5542_v32  ;;  %v5617_v21 = vld [vmem:[#allocation7 + $0x658] ss:$28 sps:$4 sm:$0xff]   ;;  %v5620_v22 = vld [vmem:[#allocation7 + $0x660] ss:$28 sps:$4 sm:$0xff]   ;;  %v5623_v32 = vld [vmem:[#allocation7 + $0x690] ss:$28 sps:$4 sm:$0xff]  }
 0x3d4   :  { %3894 = vmatprep.mubr.bf16.mxu0 %v6235_v30  ;;  %3980 = vmatprep.mubr.bf16.mxu1 %v6235_v30  ;;  %v5628_v31 = vld [vmem:[#allocation7 + $0x69c] ss:$28 sps:$4 sm:$0xff]  }
 0x3d5   :  { %3864 = vmatprep.subr.bf16.mxu0 %v5547_v33  ;;  %3950 = vmatprep.subr.bf16.mxu1 %v5550_v34  ;;  %v5626_v33 = vld [vmem:[#allocation7 + $0x698] ss:$28 sps:$4 sm:$0xff]   ;;  %v5631_v34 = vld [vmem:[#allocation7 + $0x6cc] ss:$28 sps:$4 sm:$0xff]  }
 0x3d7   :  { %3865 = vmatpush1.bf16.msra.mxu0 %v5545_v35  ;;  %3951 = vmatpush1.bf16.msra.mxu1 %v5548_v36  ;;  %v5634_v35 = vld [vmem:[#allocation7 + $0x6d4] ss:$28 sps:$4 sm:$0xff]   ;;  %v5629_v36 = vld [vmem:[#allocation7 + $0x6c8] ss:$28 sps:$4 sm:$0xff]  }
 0x3d8   :  { %3866 = vmatprep.subr.bf16.mxu0 %v5553_v37  ;;  %3952 = vmatprep.subr.bf16.mxu1 %v5556_v38  ;;  %v5632_v37 = vld [vmem:[#allocation7 + $0x6d0] ss:$28 sps:$4 sm:$0xff]  }
 0x3d9   :  { %v5637_v38 = vld [vmem:[#allocation7 + $0x14] ss:$28 sps:$4 sm:$0xff]  }
 0x3db   :  { %3867 = vmatpush1.bf16.msra.mxu0 %v5551_v39  ;;  %3953 = vmatpush1.bf16.msra.mxu1 %v5554_v40  ;;  %v5638_v39 = vld [vmem:[#allocation7 + $0x1d8] ss:$28 sps:$4 sm:$0xff]   ;;  %v5635_v40 = vld [vmem:[#allocation7 + $0x10] ss:$28 sps:$4 sm:$0xff]  }
 0x3dc   :  { %3868 = vmatprep.subr.bf16.mxu0 %v5559_v41  ;;  %3954 = vmatprep.subr.bf16.mxu1 %v5562_v42  ;;  %v5639_v41 = vld [vmem:[#allocation7 + $0x18] ss:$28 sps:$4 sm:$0xff]   ;;  %v5642_v42 = vld [vmem:[#allocation7 + $0x4c] ss:$28 sps:$4 sm:$0xff]  }
 0x3df   :  { %3869 = vmatpush1.bf16.msra.mxu0 %v5557_v43  ;;  %3955 = vmatpush1.bf16.msra.mxu1 %v5560_v44  ;;  %v5643_v43 = vld [vmem:[#allocation7 + $0x210] ss:$28 sps:$4 sm:$0xff]   ;;  %v5640_v44 = vld [vmem:[#allocation7 + $0x48] ss:$28 sps:$4 sm:$0xff]  }
 0x3e0   :  { %3870 = vmatprep.subr.bf16.mxu0 %v5565_v17  ;;  %3956 = vmatprep.subr.bf16.mxu1 %v5568_v45  ;;  %v5644_v17 = vld [vmem:[#allocation7 + $0x50] ss:$28 sps:$4 sm:$0xff]   ;;  %v5647_v45 = vld [vmem:[#allocation7 + $0x84] ss:$28 sps:$4 sm:$0xff]  }
 0x3e3   :  { %3871 = vmatpush1.bf16.msra.mxu0 %v5563_v18  ;;  %3957 = vmatpush1.bf16.msra.mxu1 %v5566_v46  ;;  %v5648_v18 = vld [vmem:[#allocation7 + $0x248] ss:$28 sps:$4 sm:$0xff]   ;;  %v5645_v46 = vld [vmem:[#allocation7 + $0x80] ss:$28 sps:$4 sm:$0xff]  }
 0x3e4   :  { %3872 = vmatprep.subr.bf16.mxu0 %v5571_v47  ;;  %3958 = vmatprep.subr.bf16.mxu1 %v5574_v48  ;;  %v5649_v47 = vld [vmem:[#allocation7 + $0x88] ss:$28 sps:$4 sm:$0xff]   ;;  %v5652_v48 = vld [vmem:[#allocation7 + $0xbc] ss:$28 sps:$4 sm:$0xff]  }
 0x3e7   :  { %3873 = vmatpush1.bf16.msra.mxu0 %v5569_v49  ;;  %3959 = vmatpush1.bf16.msra.mxu1 %v5572_v50  ;;  %v5653_v49 = vld [vmem:[#allocation7 + $0x280] ss:$28 sps:$4 sm:$0xff]   ;;  %v5650_v50 = vld [vmem:[#allocation7 + $0xb8] ss:$28 sps:$4 sm:$0xff]  }
 0x3e8   :  { %3874 = vmatprep.subr.bf16.mxu0 %v5577_v51  ;;  %3960 = vmatprep.subr.bf16.mxu1 %v5580_v52  ;;  %v5654_v51 = vld [vmem:[#allocation7 + $0xc0] ss:$28 sps:$4 sm:$0xff]   ;;  %v5657_v52 = vld [vmem:[#allocation7 + $0xf4] ss:$28 sps:$4 sm:$0xff]  }
 0x3eb   :  { %3875 = vmatpush1.bf16.msra.mxu0 %v5575_v53  ;;  %3961 = vmatpush1.bf16.msra.mxu1 %v5578_v54  ;;  %v5655_v53 = vld [vmem:[#allocation7 + $0xf0] ss:$28 sps:$4 sm:$0xff]   ;;  %v5659_v54 = vld [vmem:[#allocation7 + $0xf8] ss:$28 sps:$4 sm:$0xff]  }
 0x3ec   :  { %3876 = vmatprep.subr.bf16.mxu0 %v5583_v55  ;;  %3962 = vmatprep.subr.bf16.mxu1 %v5586_v56  ;;  %v5662_v55 = vld [vmem:[#allocation7 + $0x12c] ss:$28 sps:$4 sm:$0xff]  }
 0x3ed   :  { %v5663_v56 = vld [vmem:[#allocation7 + $0x2f0] ss:$28 sps:$4 sm:$0xff]  }
 0x3ef   :  { %3877 = vmatpush1.bf16.msra.mxu0 %v5581_v57  ;;  %3963 = vmatpush1.bf16.msra.mxu1 %v5584_v58  ;;  %v5660_v57 = vld [vmem:[#allocation7 + $0x128] ss:$28 sps:$4 sm:$0xff]   ;;  %v5664_v58 = vld [vmem:[#allocation7 + $0x130] ss:$28 sps:$4 sm:$0xff]  }
 0x3f0   :  { %3878 = vmatprep.subr.bf16.mxu0 %v5589_v59  ;;  %3964 = vmatprep.subr.bf16.mxu1 %v5592_v60  ;;  %v5667_v59 = vld [vmem:[#allocation7 + $0x164] ss:$28 sps:$4 sm:$0xff]  }
 0x3f1   :  { %v5668_v60 = vld [vmem:[#allocation7 + $0x328] ss:$28 sps:$4 sm:$0xff]  }
 0x3f3   :  { %3879 = vmatpush1.bf16.msra.mxu0 %v5587_v0  ;;  %3965 = vmatpush1.bf16.msra.mxu1 %v5590_v61  ;;  %v5665_v0 = vld [vmem:[#allocation7 + $0x160] ss:$28 sps:$4 sm:$0xff]   ;;  %v5669_v61 = vld [vmem:[#allocation7 + $0x168] ss:$28 sps:$4 sm:$0xff]  }
 0x3f4   :  { %3880 = vmatprep.subr.bf16.mxu0 %v5595_v62  ;;  %3966 = vmatprep.subr.bf16.mxu1 %v5598_v63  ;;  %v5672_v62 = vld [vmem:[#allocation7 + $0x19c] ss:$28 sps:$4 sm:$0xff]  }
 0x3f5   :  { %v5673_v63 = vld [vmem:[#allocation7 + $0x360] ss:$28 sps:$4 sm:$0xff]  }
 0x3f7   :  { %3881 = vmatpush1.bf16.msra.mxu0 %v5593_v1  ;;  %3967 = vmatpush1.bf16.msra.mxu1 %v5596_v2  ;;  %v5670_v1 = vld [vmem:[#allocation7 + $0x198] ss:$28 sps:$4 sm:$0xff]   ;;  %v5674_v2 = vld [vmem:[#allocation7 + $0x1a0] ss:$28 sps:$4 sm:$0xff]  }
 0x3f8   :  { %3882 = vmatprep.subr.bf16.mxu0 %v5601_v3  ;;  %3968 = vmatprep.subr.bf16.mxu1 %v5604_v4  ;;  %v5677_v3 = vld [vmem:[#allocation7 + $0x1d4] ss:$28 sps:$4 sm:$0xff]  }
 0x3f9   :  { %v5678_v4 = vld [vmem:[#allocation7 + $0x558] ss:$28 sps:$4 sm:$0xff]  }
 0x3fb   :  { %3883 = vmatpush1.bf16.msra.mxu0 %v5599_v5  ;;  %3969 = vmatpush1.bf16.msra.mxu1 %v5602_v6  ;;  %v5675_v5 = vld [vmem:[#allocation7 + $0x1d0] ss:$28 sps:$4 sm:$0xff]   ;;  %v5679_v6 = vld [vmem:[#allocation7 + $0x398] ss:$28 sps:$4 sm:$0xff]  }
 0x3fc   :  { %3884 = vmatprep.subr.bf16.mxu0 %v5607_v7  ;;  %3970 = vmatprep.subr.bf16.mxu1 %v5610_v8  ;;  %v5682_v7 = vld [vmem:[#allocation7 + $0x20c] ss:$28 sps:$4 sm:$0xff]  }
 0x3fd   :  { %v5683_v8 = vld [vmem:[#allocation7 + $0x590] ss:$28 sps:$4 sm:$0xff]  }
 0x3ff   :  { %3885 = vmatpush1.bf16.msra.mxu0 %v5605_v9  ;;  %3971 = vmatpush1.bf16.msra.mxu1 %v5608_v10  ;;  %v5680_v9 = vld [vmem:[#allocation7 + $0x208] ss:$28 sps:$4 sm:$0xff]   ;;  %v5684_v10 = vld [vmem:[#allocation7 + $0x3d0] ss:$28 sps:$4 sm:$0xff]  }
 0x400   :  { %3886 = vmatprep.subr.bf16.mxu0 %v5613_v11  ;;  %3972 = vmatprep.subr.bf16.mxu1 %v5616_v12  ;;  %v5687_v11 = vld [vmem:[#allocation7 + $0x244] ss:$28 sps:$4 sm:$0xff]  }
 0x401   :  { %v5688_v12 = vld [vmem:[#allocation7 + $0x5c8] ss:$28 sps:$4 sm:$0xff]  }
 0x403   :  { %3887 = vmatpush1.bf16.msra.mxu0 %v5611_v14  ;;  %3973 = vmatpush1.bf16.msra.mxu1 %v5614_v16  ;;  %v5685_v14 = vld [vmem:[#allocation7 + $0x240] ss:$28 sps:$4 sm:$0xff]   ;;  %v5689_v16 = vld [vmem:[#allocation7 + $0x408] ss:$28 sps:$4 sm:$0xff]  }
 0x404   :  { %3888 = vmatprep.subr.bf16.mxu0 %v5619_v19  ;;  %3974 = vmatprep.subr.bf16.mxu1 %v5622_v20  ;;  %v5692_v19 = vld [vmem:[#allocation7 + $0x27c] ss:$28 sps:$4 sm:$0xff]  }
 0x405   :  { %v5693_v20 = vld [vmem:[#allocation7 + $0x600] ss:$28 sps:$4 sm:$0xff]  }
 0x407   :  { %3889 = vmatpush1.bf16.msra.mxu0 %v5617_v21  ;;  %3975 = vmatpush1.bf16.msra.mxu1 %v5620_v22  ;;  %v5690_v21 = vld [vmem:[#allocation7 + $0x278] ss:$28 sps:$4 sm:$0xff]   ;;  %v5694_v22 = vld [vmem:[#allocation7 + $0x440] ss:$28 sps:$4 sm:$0xff]  }
 0x408   :  { %3890 = vmatprep.subr.bf16.mxu0 %v5625_v25  ;;  %3976 = vmatprep.subr.bf16.mxu1 %v5628_v31  ;;  %v5697_v25 = vld [vmem:[#allocation7 + $0x2b4] ss:$28 sps:$4 sm:$0xff]  }
 0x409   :  { %v5698_v31 = vld [vmem:[#allocation7 + $0x638] ss:$28 sps:$4 sm:$0xff]  }
 0x40b   :  { %3891 = vmatpush1.bf16.msra.mxu0 %v5623_v32  ;;  %3977 = vmatpush1.bf16.msra.mxu1 %v5626_v33  ;;  %v5695_v32 = vld [vmem:[#allocation7 + $0x2b0] ss:$28 sps:$4 sm:$0xff]   ;;  %v5699_v33 = vld [vmem:[#allocation7 + $0x478] ss:$28 sps:$4 sm:$0xff]  }
 0x40c   :  { %3892 = vmatprep.subr.bf16.mxu0 %v5631_v34  ;;  %3978 = vmatprep.subr.bf16.mxu1 %v5634_v35  ;;  %v5702_v34 = vld [vmem:[#allocation7 + $0x2ec] ss:$28 sps:$4 sm:$0xff]  }
 0x40d   :  { %v5703_v35 = vld [vmem:[#allocation7 + $0x670] ss:$28 sps:$4 sm:$0xff]  }
 0x40f   :  { %3893 = vmatpush1.bf16.msra.mxu0 %v5629_v36  ;;  %3979 = vmatpush1.bf16.msra.mxu1 %v5632_v37  ;;  %v5700_v36 = vld [vmem:[#allocation7 + $0x2e8] ss:$28 sps:$4 sm:$0xff]   ;;  %v5704_v37 = vld [vmem:[#allocation7 + $0x4b0] ss:$28 sps:$4 sm:$0xff]  }
 0x410   :  { %3991 = vmatprep.subr.bf16.mxu0 %v5637_v38  ;;  %4871 = vmatprep.subr.bf16.mxu1 %v5638_v39  ;;  %v5707_v38 = vld [vmem:[#allocation7 + $0x324] ss:$28 sps:$4 sm:$0xff]  }
 0x411   :  { %v5708_v39 = vld [vmem:[#allocation7 + $0x6a8] ss:$28 sps:$4 sm:$0xff]  }
 0x412   :  { %3895 = vmatmul.mubr.bf16.vlgmr.msra.gmra.mrb[12].mxu0 %v6231_v28  ;;  %3981 = vmatmul.mubr.bf16.vlgmr.msra.gmra.mrb[16].mxu1 %v6231_v28 }
 0x413   :  { %3992 = vmatpush1.bf16.msra.mxu0 %v5635_v40  ;;  %4023 = vmatprep.mubr.bf16.mxu0 %v6233_v29  ;;  %v5705_v40 = vld [vmem:[#allocation7 + $0x320] ss:$28 sps:$4 sm:$0xff]  }
 0x414   :  { %4872 = vmatpush3.bf16.msra.mxu1 %v5639_v41  ;;  %4109 = vmatprep.mubr.bf16.mxu1 %v6233_v29  ;;  %v5658_v29 = vld [vmem:[#allocation7 + $0x2b8] ss:$28 sps:$4 sm:$0xff]   ;;  %v5709_v41 = vld [vmem:[#allocation7 + $0x4e8] ss:$28 sps:$4 sm:$0xff]  }
 0x415   :  { %3993 = vmatprep.subr.bf16.mxu0 %v5642_v42  ;;  %4873 = vmatprep.subr.bf16.mxu1 %v5643_v43  ;;  %v5712_v42 = vld [vmem:[#allocation7 + $0x35c] ss:$28 sps:$4 sm:$0xff]  }
 0x416   :  { %v5713_v43 = vld [vmem:[#allocation7 + $0x6e0] ss:$28 sps:$4 sm:$0xff]  }
 0x417   :  { %3994 = vmatpush1.bf16.msra.mxu0 %v5640_v44  ;;  %v5710_v44 = vld [vmem:[#allocation7 + $0x358] ss:$28 sps:$4 sm:$0xff]  }
 0x418   :  { %4874 = vmatpush3.bf16.msra.mxu1 %v5644_v17  ;;  %3995 = vmatprep.subr.bf16.mxu0 %v5647_v45  ;;  %v5714_v17 = vld [vmem:[#allocation7 + $0x520] ss:$28 sps:$4 sm:$0xff]   ;;  %v5717_v45 = vld [vmem:[#allocation7 + $0x394] ss:$28 sps:$4 sm:$0xff]  }
 0x419   :  { %4875 = vmatprep.subr.bf16.mxu1 %v5648_v18  ;;  %v5715_v18 = vld [vmem:[#allocation7 + $0x390] ss:$28 sps:$4 sm:$0xff]  }
 0x41b   :  { %3996 = vmatpush1.bf16.msra.mxu0 %v5645_v46  ;;  %v5720_v46 = vld [vmem:[#allocation7 + $0x3cc] ss:$28 sps:$4 sm:$0xff]  }
 0x41c   :  { %4876 = vmatpush3.bf16.msra.mxu1 %v5649_v47  ;;  %3997 = vmatprep.subr.bf16.mxu0 %v5652_v48  ;;  %v5718_v47 = vld [vmem:[#allocation7 + $0x3c8] ss:$28 sps:$4 sm:$0xff]  }
 0x41d   :  { %4877 = vmatprep.subr.bf16.mxu1 %v5653_v49  ;;  %v5723_v48 = vld [vmem:[#allocation7 + $0x404] ss:$28 sps:$4 sm:$0xff]  }
 0x41e   :  { %v5721_v49 = vld [vmem:[#allocation7 + $0x400] ss:$28 sps:$4 sm:$0xff]  }
 0x41f   :  { %3998 = vmatpush1.bf16.msra.mxu0 %v5650_v50  ;;  %v5726_v50 = vld [vmem:[#allocation7 + $0x43c] ss:$28 sps:$4 sm:$0xff]  }
 0x420   :  { %4878 = vmatpush3.bf16.msra.mxu1 %v5654_v51  ;;  %3999 = vmatprep.subr.bf16.mxu0 %v5657_v52  ;;  %v5724_v51 = vld [vmem:[#allocation7 + $0x438] ss:$28 sps:$4 sm:$0xff]  }
 0x421   :  { %4879 = vmatprep.subr.bf16.mxu1 %v5658_v29  ;;  %v5729_v52 = vld [vmem:[#allocation7 + $0x474] ss:$28 sps:$4 sm:$0xff]  }
 0x422   :  { %v5727_v29 = vld [vmem:[#allocation7 + $0x470] ss:$28 sps:$4 sm:$0xff]  }
 0x423   :  { %4000 = vmatpush1.bf16.msra.mxu0 %v5655_v53  ;;  %v5730_v53 = vld [vmem:[#allocation7 + $0x4a8] ss:$28 sps:$4 sm:$0xff]  }
 0x424   :  { %4880 = vmatpush3.bf16.msra.mxu1 %v5659_v54  ;;  %4001 = vmatprep.subr.bf16.mxu0 %v5662_v55  ;;  %v5735_v54 = vld [vmem:[#allocation7 + $0x4e4] ss:$28 sps:$4 sm:$0xff]   ;;  %v5738_v55 = vld [vmem:[#allocation7 + $0x51c] ss:$28 sps:$4 sm:$0xff]  }
 0x425   :  { %4881 = vmatprep.subr.bf16.mxu1 %v5663_v56  ;;  %v5736_v56 = vld [vmem:[#allocation7 + $0x518] ss:$28 sps:$4 sm:$0xff]  }
 0x427   :  { %4002 = vmatpush1.bf16.msra.mxu0 %v5660_v57  ;;  %v5741_v57 = vld [vmem:[#allocation7 + $0x554] ss:$28 sps:$4 sm:$0xff]  }
 0x428   :  { %4882 = vmatpush3.bf16.msra.mxu1 %v5664_v58  ;;  %4003 = vmatprep.subr.bf16.mxu0 %v5667_v59  ;;  %v5739_v58 = vld [vmem:[#allocation7 + $0x550] ss:$28 sps:$4 sm:$0xff]  }
 0x429   :  { %4883 = vmatprep.subr.bf16.mxu1 %v5668_v60  ;;  %v5744_v59 = vld [vmem:[#allocation7 + $0x58c] ss:$28 sps:$4 sm:$0xff]  }
 0x42a   :  { %v5742_v60 = vld [vmem:[#allocation7 + $0x588] ss:$28 sps:$4 sm:$0xff]  }
 0x42b   :  { %4004 = vmatpush1.bf16.msra.mxu0 %v5665_v0  ;;  %v5747_v0 = vld [vmem:[#allocation7 + $0x5c4] ss:$28 sps:$4 sm:$0xff]  }
 0x42c   :  { %4884 = vmatpush3.bf16.msra.mxu1 %v5669_v61  ;;  %4005 = vmatprep.subr.bf16.mxu0 %v5672_v62  ;;  %v5745_v61 = vld [vmem:[#allocation7 + $0x5c0] ss:$28 sps:$4 sm:$0xff]  }
 0x42d   :  { %4885 = vmatprep.subr.bf16.mxu1 %v5673_v63  ;;  %v5750_v62 = vld [vmem:[#allocation7 + $0x5fc] ss:$28 sps:$4 sm:$0xff]  }
 0x42e   :  { %v5748_v63 = vld [vmem:[#allocation7 + $0x5f8] ss:$28 sps:$4 sm:$0xff]  }
 0x42f   :  { %4006 = vmatpush1.bf16.msra.mxu0 %v5670_v1  ;;  %v5753_v1 = vld [vmem:[#allocation7 + $0x634] ss:$28 sps:$4 sm:$0xff]  }
 0x430   :  { %4886 = vmatpush3.bf16.msra.mxu1 %v5674_v2  ;;  %4007 = vmatprep.subr.bf16.mxu0 %v5677_v3  ;;  %v5751_v2 = vld [vmem:[#allocation7 + $0x630] ss:$28 sps:$4 sm:$0xff]  }
 0x431   :  { %4893 = vmatprep.subr.bf16.mxu1 %v5678_v4  ;;  %v5756_v3 = vld [vmem:[#allocation7 + $0x66c] ss:$28 sps:$4 sm:$0xff]  }
 0x432   :  { %v5754_v4 = vld [vmem:[#allocation7 + $0x668] ss:$28 sps:$4 sm:$0xff]  }
 0x433   :  { %4110 = vmatmul.mubr.bf16.vlgmr.msra.gmra.mrb[20].mxu1 %v6229_v27  ;;  %4008 = vmatpush1.bf16.msra.mxu0 %v5675_v5  ;;  %v5759_v5 = vld [vmem:[#allocation7 + $0x6a4] ss:$28 sps:$4 sm:$0xff]  }
 0x434   :  { %4894 = vmatpush3.bf16.msra.mxu1 %v5679_v6  ;;  %4150 = vmatprep.mubr.bf16.mxu1 %v6235_v30  ;;  %v5757_v6 = vld [vmem:[#allocation7 + $0x6a0] ss:$28 sps:$4 sm:$0xff]  }
 0x435   :  { %4009 = vmatprep.subr.bf16.mxu0 %v5682_v7  ;;  %4895 = vmatprep.subr.bf16.mxu1 %v5683_v8  ;;  %v5762_v7 = vld [vmem:[#allocation7 + $0x6dc] ss:$28 sps:$4 sm:$0xff]  }
 0x436   :  { %v5760_v8 = vld [vmem:[#allocation7 + $0x6d8] ss:$28 sps:$4 sm:$0xff]  }
 0x437   :  { %4010 = vmatpush1.bf16.msra.mxu0 %v5680_v9  ;;  %v6256_v9 = vld [vmem:[%s6307_s8] sm:$0xff]  ;;  %s5948_s8 = smov [#allocation9]  }
 0x438   :  { %4896 = vmatpush3.bf16.msra.mxu1 %v5684_v10  ;;  %4011 = vmatprep.subr.bf16.mxu0 %v5687_v11  ;;  %v2635_v10 = vrot.slane %v6256_v9, %v6099_v24  ;;  %v2643_v11 = vrot.slane %v6256_v9, %v6115_v13  ;;  %s4276_s0 = sshll.u32 %s5948_s8, 4  ;;  %s4277_s0 = int_to_ptr.vmem [resolvable:$true] %s4276_s0 }
 0x439   :  { %4897 = vmatprep.subr.bf16.mxu1 %v5688_v12  ;;  %v2639_v12 = vrot.slane %v6256_v9, %v6105_v26  ;;  %s5886_s12 = scalar_lea.vmem %s4277_s0, 256  ;;  %p5891_p11 = scmp.lt.s32.totalorder %s4277_s0, %s4277_s0 }
 0x43a   :  { %p5887_p10 = scmp.ne.s32.totalorder %s4277_s0, %s5886_s12  ;;  %p5892_p12 = scmp.lt.s32.totalorder %s5886_s12, %s5886_s12 }
 0x43b   :  { %4012 = vmatpush1.bf16.msra.mxu0 %v5685_v14  ;;  %v2647_v14 = vrot.slane %v6256_v9, %v6118_v15 }
 0x43c   :  { %4898 = vmatpush3.bf16.msra.mxu1 %v5689_v16  ;;  %4013 = vmatprep.subr.bf16.mxu0 %v5692_v19  ;;  %p5893_p13 = por %p5892_p12, %p5891_p11 }
 0x43d   :  { %4899 = vmatprep.subr.bf16.mxu1 %v5693_v20 }
 0x43e   :  { %p5894_p0 = pnand %p5893_p13, %p5887_p10 }
 0x43f   :  { %4014 = vmatpush1.bf16.msra.mxu0 %v5690_v21 }
 0x440   :  { %4900 = vmatpush3.bf16.msra.mxu1 %v5694_v22  ;;  %4015 = vmatprep.subr.bf16.mxu0 %v5697_v25 }
 0x441   :  { %4901 = vmatprep.subr.bf16.mxu1 %v5698_v31 }
 0x443   :  { %4016 = vmatpush1.bf16.msra.mxu0 %v5695_v32 }
 0x444   :  { %4902 = vmatpush3.bf16.msra.mxu1 %v5699_v33  ;;  %4017 = vmatprep.subr.bf16.mxu0 %v5702_v34 }
 0x445   :  { %4903 = vmatprep.subr.bf16.mxu1 %v5703_v35 }
 0x447   :  { %4018 = vmatpush1.bf16.msra.mxu0 %v5700_v36 }
 0x448   :  { %4904 = vmatpush3.bf16.msra.mxu1 %v5704_v37  ;;  %4019 = vmatprep.subr.bf16.mxu0 %v5707_v38 }
 0x449   :  { %4905 = vmatprep.subr.bf16.mxu1 %v5708_v39 }
 0x44b   :  { %4020 = vmatpush1.bf16.msra.mxu0 %v5705_v40 }
 0x44c   :  { %4906 = vmatpush3.bf16.msra.mxu1 %v5709_v41  ;;  %4021 = vmatprep.subr.bf16.mxu0 %v5712_v42 }
 0x44d   :  { %4907 = vmatprep.subr.bf16.mxu1 %v5713_v43 }
 0x44f   :  { %4022 = vmatpush1.bf16.msra.mxu0 %v5710_v44 }
 0x450   :  { %4908 = vmatpush3.bf16.msra.mxu1 %v5714_v17  ;;  %4034 = vmatprep.subr.bf16.mxu0 %v5717_v45 }
 0x452   :  { %4024 = vmatmul.mubr.bf16.vlgmr.msra.gmra.mrb[16].mxu0 %v6229_v27  ;;  %v5732_v27 = vld [vmem:[#allocation7 + $0x4ac] ss:$28 sps:$4 sm:$0xff]  }
 0x453   :  { %4151 = vmatmul.mubr.bf16.vlgmr.msra.gmra.mrb[24].mxu1 %v6231_v28  ;;  %4035 = vmatpush1.bf16.msra.mxu0 %v5715_v18 }
 0x454   :  { %4066 = vmatprep.mubr.bf16.mxu0 %v6235_v30  ;;  %4036 = vmatprep.subr.bf16.mxu0 %v5720_v46  ;;  %v5733_v30 = vld [vmem:[#allocation7 + $0x4e0] ss:$28 sps:$4 sm:$0xff]  }
 0x457   :  { %4037 = vmatpush1.bf16.msra.mxu0 %v5718_v47 }
 0x458   :  { %4038 = vmatprep.subr.bf16.mxu0 %v5723_v48 }
 0x45b   :  { %4039 = vmatpush1.bf16.msra.mxu0 %v5721_v49 }
 0x45c   :  { %4040 = vmatprep.subr.bf16.mxu0 %v5726_v50 }
 0x45f   :  { %4041 = vmatpush1.bf16.msra.mxu0 %v5724_v51 }
 0x460   :  { %4042 = vmatprep.subr.bf16.mxu0 %v5729_v52 }
 0x463   :  { %4043 = vmatpush1.bf16.msra.mxu0 %v5727_v29 }
 0x464   :  { %4044 = vmatprep.subr.bf16.mxu0 %v5732_v27 }
 0x467   :  { %4045 = vmatpush1.bf16.msra.mxu0 %v5730_v53 }
 0x468   :  { %4046 = vmatprep.subr.bf16.mxu0 %v5735_v54 }
 0x46b   :  { %4047 = vmatpush1.bf16.msra.mxu0 %v5733_v30 }
 0x46c   :  { %4048 = vmatprep.subr.bf16.mxu0 %v5738_v55 }
 0x46f   :  { %4049 = vmatpush1.bf16.msra.mxu0 %v5736_v56 }
 0x470   :  { %4050 = vmatprep.subr.bf16.mxu0 %v5741_v57 }
 0x473   :  { %4051 = vmatpush1.bf16.msra.mxu0 %v5739_v58 }
 0x474   :  { %4052 = vmatprep.subr.bf16.mxu0 %v5744_v59 }
 0x477   :  { %4053 = vmatpush1.bf16.msra.mxu0 %v5742_v60 }
 0x478   :  { %4054 = vmatprep.subr.bf16.mxu0 %v5747_v0 }
 0x47b   :  { %4055 = vmatpush1.bf16.msra.mxu0 %v5745_v61 }
 0x47c   :  { %4056 = vmatprep.subr.bf16.mxu0 %v5750_v62 }
 0x47f   :  { %4057 = vmatpush1.bf16.msra.mxu0 %v5748_v63 }
 0x480   :  { %4058 = vmatprep.subr.bf16.mxu0 %v5753_v1 }
 0x483   :  { %4059 = vmatpush1.bf16.msra.mxu0 %v5751_v2 }
 0x484   :  { %4060 = vmatprep.subr.bf16.mxu0 %v5756_v3 }
 0x487   :  { %4061 = vmatpush1.bf16.msra.mxu0 %v5754_v4 }
 0x488   :  { %4062 = vmatprep.subr.bf16.mxu0 %v5759_v5 }
 0x48b   :  { %4063 = vmatpush1.bf16.msra.mxu0 %v5757_v6 }
 0x48c   :  { %4064 = vmatprep.subr.bf16.mxu0 %v5762_v7 }
 0x48f   :  { %4065 = vmatpush1.bf16.msra.mxu0 %v5760_v8 }
 0x492   :  { %4067 = vmatmul.mubr.bf16.vlgmr.msra.gmra.mrb[16].mxu0 %v6231_v28 }
 0x4e5   :  { %v3896_v16 = vpop.f32.mrb[12].mxu0  ;;  %v3982_v19 = vpop.f32.mrb[16].mxu1 }
 0x4e6   :  { %v4991_v28 = vadd.f32 %v3896_v16, %v2635_v10  ;;  %v4995_v20 = vadd.f32 %v3982_v19, %v2643_v11  ;;  %v3898_v21 = vpop.f32.mrb[13].mxu0  ;;  %v3984_v22 = vpop.f32.mrb[17].mxu1 }
 0x4e7   :  { %v4992_v25 = vadd.f32 %v3898_v21, %v2639_v12  ;;  %v4996_v31 = vadd.f32 %v3984_v22, %v2647_v14  ;;  %v3900_v32 = vpop.f32.mrb[14].mxu0  ;;  %v3986_v33 = vpop.f32.mrb[18].mxu1 }
 0x4e8   :  { %v4781_v24 = vmul.f32 -1.442695, %v4991_v28  ;;  %v4783_v34 = vmul.f32 -1.442695, %v4995_v20  ;;  %v4993_v35 = vadd.f32 %v3900_v32, %v2635_v10  ;;  %v4997_v13 = vadd.f32 %v3986_v33, %v2643_v11  ;;  %v3902_v36 = vpop.f32.mrb[15].mxu0  ;;  %v3988_v37 = vpop.f32.mrb[19].mxu1 }
 0x4e9   :  { %v4782_v26 = vmul.f32 -1.442695, %v4992_v25  ;;  %v4784_v38 = vmul.f32 -1.442695, %v4996_v31  ;;  %v4994_v39 = vadd.f32 %v3902_v36, %v2639_v12  ;;  %v4998_v15 = vadd.f32 %v3988_v37, %v2647_v14 }
 0x4ea   :  { %5763 = vpow2.f32 %v4781_v24  ;;  %v4788_v40 = vmul.f32 -1.442695, %v4993_v35  ;;  %v4790_v41 = vmul.f32 -1.442695, %v4997_v13 }
 0x4eb   :  { %5765 = vpow2.f32 %v4783_v34  ;;  %v4789_v42 = vmul.f32 -1.442695, %v4994_v39  ;;  %v4791_v43 = vmul.f32 -1.442695, %v4998_v15 }
 0x4ec   :  { %5767 = vpow2.f32 %v4782_v26 }
 0x4ed   :  { %5769 = vpow2.f32 %v4784_v38 }
 0x4ee   :  { %5771 = vpow2.f32 %v4788_v40 }
 0x4ef   :  { %5773 = vpow2.f32 %v4790_v41 }
 0x4f0   :  { %5775 = vpow2.f32 %v4789_v42 }
 0x4f1   :  { %5777 = vpow2.f32 %v4791_v43 }
 0x4f4   :  { %v5764_v44 = vpop.eup %5763 }
 0x4f5   :  { %v5766_v17 = vpop.eup %5765  ;;  %v4201_v45 = vadd.f32 1.0, %v5764_v44 }
 0x4f6   :  { %v5768_v18 = vpop.eup %5767  ;;  %v4203_v46 = vadd.f32 1.0, %v5766_v17 }
 0x4f7   :  { %v5770_v47 = vpop.eup %5769  ;;  %5779 = vrcp.f32 %v4201_v45  ;;  %v4202_v48 = vadd.f32 1.0, %v5768_v18 }
 0x4f8   :  { %v5772_v49 = vpop.eup %5771  ;;  %5781 = vrcp.f32 %v4203_v46  ;;  %v4204_v50 = vadd.f32 1.0, %v5770_v47 }
 0x4f9   :  { %v5774_v51 = vpop.eup %5773  ;;  %5783 = vrcp.f32 %v4202_v48  ;;  %v4208_v52 = vadd.f32 1.0, %v5772_v49 }
 0x4fa   :  { %v5776_v29 = vpop.eup %5775  ;;  %5785 = vrcp.f32 %v4204_v50  ;;  %v4210_v27 = vadd.f32 1.0, %v5774_v51 }
 0x4fb   :  { %v5778_v53 = vpop.eup %5777  ;;  %5787 = vrcp.f32 %v4208_v52  ;;  %v4209_v54 = vadd.f32 1.0, %v5776_v29 }
 0x4fc   :  { %5789 = vrcp.f32 %v4210_v27  ;;  %v4211_v30 = vadd.f32 1.0, %v5778_v53 }
 0x4fd   :  { %5791 = vrcp.f32 %v4209_v54 }
 0x4fe   :  { %5793 = vrcp.f32 %v4211_v30 }
 0x501   :  { %v5780_v55 = vpop.eup %5779 }
 0x502   :  { %v5782_v56 = vpop.eup %5781  ;;  %4243 = vst [vmem:[#allocation8] sm:$0xff] %v5780_v55 }
 0x503   :  { %v5784_v57 = vpop.eup %5783  ;;  %4245 = vst [vmem:[#allocation8 + $0x10] sm:$0xff] %v5782_v56 }
 0x504   :  { %v5786_v58 = vpop.eup %5785  ;;  %4244 = vst [vmem:[#allocation8 + $0x8] sm:$0xff] %v5784_v57 }
 0x505   :  { %v5788_v59 = vpop.eup %5787  ;;  %4246 = vst [vmem:[#allocation8 + $0x18] sm:$0xff] %v5786_v58 }
 0x506   :  { %v5790_v60 = vpop.eup %5789  ;;  %4250 = vst [vmem:[#allocation8 + $0x38] sm:$0xff] %v5788_v59  ;;  %v4887_v0 = vpop.f32.mrb[20].mxu1 }
 0x507   :  { %v5792_v61 = vpop.eup %5791  ;;  %4252 = vst [vmem:[#allocation8 + $0x48] sm:$0xff] %v5790_v60  ;;  %v4888_v62 = vpop.f32.mrb[21].mxu1 }
 0x508   :  { %v5794_v63 = vpop.eup %5793  ;;  %4251 = vst [vmem:[#allocation8 + $0x40] sm:$0xff] %v5792_v61  ;;  %v4889_v1 = vadd.f32 %v4888_v62, %v4887_v0  ;;  %v4890_v2 = vpop.f32.mrb[22].mxu1 }
 0x509   :  { %4253 = vst [vmem:[#allocation8 + $0x50] sm:$0xff] %v5794_v63  ;;  %v4891_v3 = vpop.f32.mrb[23].mxu1 }
 0x50a   :  { %v4892_v4 = vadd.f32 %v4891_v3, %v4890_v2 }
 0x50b   :  { %5897 = shalt.err (!%p5894_p0)
}
 0x50c   :  { %s5898_s28 = scalar_lea.hbm %s6309_s10, 256 }
 0x50d   :  { %p5899_p1 = scmp.ne.s32.totalorder %s6309_s10, %s5898_s28  ;;  %p5902_p2 = scmp.lt.u32.totalorder %s5898_s28, %s6309_s10 }
 0x50f   :  { %p5904_p3 = pnand %p5902_p2, %p5899_p1 }
 0x511   :  { %5907 = shalt.err (!%p5904_p3)
}
 0x512   :  { %4282 = dma.vmem_to_hbm [thread:$0]  %s4277_s0, 256, %s6309_s10, [#allocation10], %s5939_s23, %s5939_s23, %s5940_s24   ;;  %v2658_v5 = vsub.s32 6, %v6096_v23  ;;  %v2650_v35 = vsub.s32 4, %v6096_v23  ;;  %v2654_v13 = vsub.s32 5, %v6096_v23 }
 0x513   :  { %s5949_s10 = smov [#allocation8]  }
 0x514   :  { %v2659_v6 = vrot.slane %v6256_v9, %v2658_v5  ;;  %v2651_v36 = vrot.slane %v6256_v9, %v2650_v35  ;;  %v2655_v37 = vrot.slane %v6256_v9, %v2654_v13  ;;  %s4264_s23 = sshll.u32 %s5949_s10, 4  ;;  %s4265_s23 = int_to_ptr.vmem [resolvable:$true] %s4264_s23 }
 0x515   :  { %s5908_s24 = scalar_lea.vmem %s4265_s23, 1792  ;;  %p5913_p5 = scmp.lt.s32.totalorder %s4265_s23, %s4265_s23 }
 0x516   :  { %v4112_v10 = vadd.f32 %v4889_v1, %v2659_v6  ;;  %v4115_v16 = vadd.f32 %v4892_v4, %v2659_v6  ;;  %p5909_p4 = scmp.ne.s32.totalorder %s4265_s23, %s5908_s24  ;;  %p5914_p6 = scmp.lt.s32.totalorder %s5908_s24, %s5908_s24 }
 0x518   :  { %p5915_p7 = por %p5914_p6, %p5913_p5 }
 0x51a   :  { %p5916_p8 = pnand %p5915_p7, %p5909_p4 }
 0x526   :  { %v4909_v7 = vpop.f32.mrb[24].mxu1 }
 0x527   :  { %v4910_v8 = vpop.f32.mrb[25].mxu1 }
 0x528   :  { %v4911_v11 = vadd.f32 %v4910_v8, %v4909_v7  ;;  %v4912_v12 = vpop.f32.mrb[26].mxu1 }
 0x529   :  { %v4913_v14 = vpop.f32.mrb[27].mxu1 }
 0x52a   :  { %v4153_v19 = vadd.f32 %v4911_v11, %v4112_v10  ;;  %v4914_v28 = vadd.f32 %v4913_v14, %v4912_v12 }
 0x52c   :  { %v4787_v20 = vmul.f32 -1.442695, %v4153_v19  ;;  %v4156_v21 = vadd.f32 %v4914_v28, %v4115_v16 }
 0x52e   :  { %5795 = vpow2.f32 %v4787_v20  ;;  %v4794_v22 = vmul.f32 -1.442695, %v4156_v21 }
 0x530   :  { %5797 = vpow2.f32 %v4794_v22 }
 0x538   :  { %v5796_v25 = vpop.eup %5795 }
 0x539   :  { %v4207_v31 = vadd.f32 1.0, %v5796_v25 }
 0x53a   :  { %v5798_v32 = vpop.eup %5797 }
 0x53b   :  { %5799 = vrcp.f32 %v4207_v31  ;;  %v4214_v33 = vadd.f32 1.0, %v5798_v32 }
 0x53d   :  { %5801 = vrcp.f32 %v4214_v33 }
 0x545   :  { %v5800_v24 = vpop.eup %5799 }
 0x546   :  { %4249 = vst [vmem:[#allocation8 + $0x30] sm:$0xff] %v5800_v24 }
 0x547   :  { %v5802_v34 = vpop.eup %5801 }
 0x548   :  { %4256 = vst [vmem:[#allocation8 + $0x68] sm:$0xff] %v5802_v34 }
 0x565   :  { %v4068_v26 = vpop.f32.mrb[16].mxu0 }
 0x566   :  { %v4999_v38 = vadd.f32 %v4068_v26, %v2651_v36  ;;  %v4070_v39 = vpop.f32.mrb[17].mxu0 }
 0x567   :  { %v5000_v15 = vadd.f32 %v4070_v39, %v2655_v37  ;;  %v4072_v40 = vpop.f32.mrb[18].mxu0 }
 0x568   :  { %v4785_v41 = vmul.f32 -1.442695, %v4999_v38  ;;  %v5001_v42 = vadd.f32 %v4072_v40, %v2651_v36  ;;  %v4074_v43 = vpop.f32.mrb[19].mxu0 }
 0x569   :  { %v4786_v44 = vmul.f32 -1.442695, %v5000_v15  ;;  %v5002_v17 = vadd.f32 %v4074_v43, %v2655_v37 }
 0x56a   :  { %5803 = vpow2.f32 %v4785_v41  ;;  %v4792_v45 = vmul.f32 -1.442695, %v5001_v42 }
 0x56b   :  { %5805 = vpow2.f32 %v4786_v44  ;;  %v4793_v18 = vmul.f32 -1.442695, %v5002_v17 }
 0x56c   :  { %5807 = vpow2.f32 %v4792_v45 }
 0x56d   :  { %5809 = vpow2.f32 %v4793_v18 }
 0x574   :  { %v5804_v23 = vpop.eup %5803 }
 0x575   :  { %v5806_v46 = vpop.eup %5805  ;;  %v4205_v47 = vadd.f32 1.0, %v5804_v23 }
 0x576   :  { %v5808_v9 = vpop.eup %5807  ;;  %v4206_v48 = vadd.f32 1.0, %v5806_v46 }
 0x577   :  { %v5810_v49 = vpop.eup %5809  ;;  %5811 = vrcp.f32 %v4205_v47  ;;  %v4212_v50 = vadd.f32 1.0, %v5808_v9 }
 0x578   :  { %5813 = vrcp.f32 %v4206_v48  ;;  %v4213_v51 = vadd.f32 1.0, %v5810_v49 }
 0x579   :  { %5815 = vrcp.f32 %v4212_v50 }
 0x57a   :  { %5817 = vrcp.f32 %v4213_v51 }
 0x581   :  { %v5812_v52 = vpop.eup %5811 }
 0x582   :  { %v5814_v29 = vpop.eup %5813  ;;  %4247 = vst [vmem:[#allocation8 + $0x20] sm:$0xff] %v5812_v52 }
 0x583   :  { %v5816_v27 = vpop.eup %5815  ;;  %4248 = vst [vmem:[#allocation8 + $0x28] sm:$0xff] %v5814_v29 }
 0x584   :  { %v5818_v53 = vpop.eup %5817  ;;  %4254 = vst [vmem:[#allocation8 + $0x58] sm:$0xff] %v5816_v27 }
 0x585   :  { %4255 = vst [vmem:[#allocation8 + $0x60] sm:$0xff] %v5818_v53 }
 0x586   :  { %5919 = shalt.err (!%p5916_p8)
}
 0x587   :  { %s5920_s19 = scalar_lea.hbm %s6308_s9, 1792 }
 0x588   :  { %p5921_p9 = scmp.ne.s32.totalorder %s6308_s9, %s5920_s19  ;;  %p5924_p10 = scmp.lt.u32.totalorder %s5920_s19, %s6308_s9 }
 0x58a   :  { %p5926_p11 = pnand %p5924_p10, %p5921_p9 }
 0x58c   :  { %5929 = shalt.err (!%p5926_p11)
}
 0x58d   :  { %s5950_s26 = smov 896   ;;  %s5951_s27 = smov 56  }
 0x58e   :  { %4270 = dma.vmem_to_hbm [thread:$0]  %s4265_s23, 1792, %s6308_s9, [#allocation4], %s5950_s26, %s5950_s26, %s5951_s27  }
 0x58f   :  { %5934 = dma.done.wait [#allocation4], 1792  }
 0x590   :  { %5935 = vsyncadd [#allocation4], 4294965504 }
 0x591   :  { %5936 = dma.done.wait [#allocation10], 256  }
 0x592   :  { %5937 = vsyncadd [#allocation10], 4294967040 }
 0x593   :  { %4289 = vsyncpa [#allocation3], 1 }
 0x594   :  { %4290 = vsyncpa [#allocation6], 1 }
 0x595   :  { %4291 = vsyncpa [#allocation4], 1 }
 0x596   :  { %4292 = vsyncpa [#allocation10], 1 }

</bundles_post_ra>
